<compile_context>
chip_gen: v6e
topology: v6e:2x2x1
jax: 0.10.0
libtpu: 0.0.40
codegen_flags: <defaults>
</compile_context>

<pallas_src>
import functools

import jax
import jax.numpy as jnp
from jax.experimental import pallas as pl
from jax.experimental.pallas import tpu as pltpu


def _pick_tile_h(H, W, cexp, budget_bytes=8 * 1024 * 1024):
    """Largest divisor of H whose fused working set (~10 live f32 copies of a
    (TILE_H+2, W, cexp) block) fits the budget; falls back to the smallest
    divisor that keeps the output block sublane-aligned."""
    per_row_bytes = W * cexp * 4 * 10
    best = None
    for th in range(1, H + 1):
        if H % th:
            continue
        if th != H and (th * W) % 8 != 0:
            continue
        if best is None or (th + 2) * per_row_bytes <= budget_bytes:
            best = th
    return best


def flkpe_forward(x_nchw, params, dim_scale=4, tile_h=None):
    """FLKPE forward.  Input (B, dim, H, W) NCHW; output
    (B, num_classes, H*dim_scale, W*dim_scale) NCHW (matches the PyTorch module)."""
    B, Cin, H, W = x_nchw.shape
    p = dim_scale
    G = p * p                        # 16 pixel-shuffle groups
    Cexp = Cin * G                   # expanded channels
    D = Cin                          # output_dim (LayerNorm width)
    K = params["w_out"].shape[1]     # num_classes
    KC = G * K                       # fused head output channels, order (p1, p2, k)

    # ---- one-time weight transforms (wrapper side) ------------------------
    # fold BatchNorm (inference mode) into the 1x1 expansion weights
    scale = params["bn_gamma"] / jnp.sqrt(params["bn_var"] + 1e-5)
    shift = params["bn_beta"] - params["bn_mean"] * scale
    w1_f = params["w1"] * scale[None, :]                       # (Cin, Cexp)
    b1_f = params["b1"] * scale + shift                        # (Cexp,)

    # grouped-LayerNorm helpers: group-mean matrix and tiled gamma/beta
    eye_g = jnp.eye(G, dtype=jnp.float32)
    a_mean = jnp.kron(eye_g, jnp.full((D, D), 1.0 / D, jnp.float32))   # (Cexp, Cexp)
    ln_g = jnp.tile(params["ln_g"], G)                         # (Cexp,)
    ln_b = jnp.tile(params["ln_b"], G)                         # (Cexp,)

    # block-diagonal head conv: channels (g, d) -> (g, k)
    w_head = jnp.kron(eye_g, params["w_out"]).astype(jnp.float32)      # (Cexp, KC)
    b_head = jnp.tile(params["b_out"], G)                      # (KC,)

    x_nhwc = jnp.transpose(x_nchw, (0, 2, 3, 1))               # (B, H, W, Cin)

    TILE_H = tile_h if tile_h is not None else _pick_tile_h(H, W, Cexp)
    assert H % TILE_H == 0
    assert TILE_H == H or (TILE_H * W) % 8 == 0
    T = H // TILE_H

    # ---- fused kernel ------------------------------------------------------
    def fused_kernel(x_ref, w1_ref, b1_ref, wdw_ref, bdw_ref,
                     am_ref, g_ref, beta_ref, wh_ref, bh_ref, o_ref):
        t = pl.program_id(1)
        n_t = pl.num_programs(1)
        r0 = pl.multiple_of(t * TILE_H, TILE_H)

        # -- gather the tile rows plus a 1-row halo (clamped at the borders)
        x_mid = x_ref[0, pl.ds(r0, TILE_H)]                          # (TILE_H, W, Cin)
        x_top = x_ref[0, pl.ds(jnp.maximum(r0 - 1, 0), 1)]           # (1, W, Cin)
        x_bot = x_ref[0, pl.ds(jnp.minimum(r0 + TILE_H, H - 1), 1)]  # (1, W, Cin)
        xh = jnp.concatenate([x_top, x_mid, x_bot], axis=0)          # (TILE_H+2, W, Cin)

        # -- 1x1 expansion (BatchNorm folded) + ReLU
        e = jnp.dot(xh.reshape((TILE_H + 2) * W, Cin), w1_ref[...],
                    preferred_element_type=jnp.float32)
        e = jnp.maximum(e + b1_ref[...], 0.0)
        e = e.reshape(TILE_H + 2, W, Cexp)

        # zero the halo rows that fall outside the image (depthwise zero pad)
        keep_top = (t > 0).astype(jnp.float32)
        keep_bot = (t < n_t - 1).astype(jnp.float32)
        e = jnp.concatenate([e[0:1] * keep_top,
                             e[1:TILE_H + 1],
                             e[TILE_H + 1:TILE_H + 2] * keep_bot], axis=0)

        # -- depthwise 3x3, padding=1
        zcol = jnp.zeros((TILE_H + 2, 1, Cexp), jnp.float32)
        e_l = jnp.concatenate([zcol, e[:, :W - 1, :]], axis=1)       # column w-1
        e_r = jnp.concatenate([e[:, 1:, :], zcol], axis=1)           # column w+1
        taps = (e_l, e, e_r)                                         # kx = 0, 1, 2
        acc = jnp.zeros((TILE_H, W, Cexp), jnp.float32)
        for ky in range(3):
            for kx in range(3):
                acc = acc + taps[kx][ky:ky + TILE_H] * wdw_ref[ky * 3 + kx]
        y = acc + bdw_ref[0]                                         # (TILE_H, W, Cexp)

        # -- grouped LayerNorm over D within each of the G groups (lane dense)
        yf = y.reshape(TILE_H * W, Cexp)
        mu = jnp.dot(yf, am_ref[...], preferred_element_type=jnp.float32)
        xc = yf - mu
        var = jnp.dot(xc * xc, am_ref[...], preferred_element_type=jnp.float32)
        xn = xc * jax.lax.rsqrt(var + 1e-5)
        xn = xn * g_ref[...] + beta_ref[...]

        # -- final 1x1 conv (block-diagonal head), output channels (p1, p2, k)
        o_ref[0] = jnp.dot(xn, wh_ref[...],
                           preferred_element_type=jnp.float32) + bh_ref[...]

    out_flat = pl.pallas_call(
        fused_kernel,
        out_shape=jax.ShapeDtypeStruct((B, H * W, KC), jnp.float32),
        grid=(B, T),
        in_specs=[
            pl.BlockSpec((1, H, W, Cin), lambda b, t: (b, 0, 0, 0)),
            pl.BlockSpec((Cin, Cexp), lambda b, t: (0, 0)),
            pl.BlockSpec((1, Cexp), lambda b, t: (0, 0)),
            pl.BlockSpec((9, Cexp), lambda b, t: (0, 0)),
            pl.BlockSpec((1, Cexp), lambda b, t: (0, 0)),
            pl.BlockSpec((Cexp, Cexp), lambda b, t: (0, 0)),
            pl.BlockSpec((1, Cexp), lambda b, t: (0, 0)),
            pl.BlockSpec((1, Cexp), lambda b, t: (0, 0)),
            pl.BlockSpec((Cexp, KC), lambda b, t: (0, 0)),
            pl.BlockSpec((1, KC), lambda b, t: (0, 0)),
        ],
        out_specs=pl.BlockSpec((1, TILE_H * W, KC), lambda b, t: (b, t, 0)),
        compiler_params=pltpu.CompilerParams(
            dimension_semantics=("parallel", "parallel"),
            vmem_limit_bytes=32 * 1024 * 1024),
    )(x_nhwc, w1_f, b1_f.reshape(1, Cexp), params["w_dw"],
      params["b_dw"].reshape(1, Cexp), a_mean, ln_g.reshape(1, Cexp),
      ln_b.reshape(1, Cexp), w_head, b_head.reshape(1, KC))

    # un-shuffle the (p1, p2, k) channels into NCHW (small, num_classes-wide)
    out = out_flat.reshape(B, H, W, p, p, K)
    out = jnp.transpose(out, (0, 5, 1, 3, 2, 4))
    return out.reshape(B, K, H * p, W * p)


# ---------------------------------------------------------------------------
# Pure-JAX reference (same math, independent implementation) for validation
# ---------------------------------------------------------------------------
def flkpe_reference(x_nchw, params, dim_scale=4):
    B, Cin, H, W = x_nchw.shape
    Cexp = Cin * 16
    D = Cin
    p = dim_scale

    y = jnp.einsum("bchw,ck->bkhw", x_nchw, params["w1"]) \
        + params["b1"][None, :, None, None]
    scale = params["bn_gamma"] / jnp.sqrt(params["bn_var"] + 1e-5)
    shift = params["bn_beta"] - params["bn_mean"] * scale
    y = y * scale[None, :, None, None] + shift[None, :, None, None]
    y = jnp.maximum(y, 0.0)

    wdw = params["w_dw"].reshape(3, 3, Cexp)               # (ky, kx, c)
    w_oihw = jnp.transpose(wdw, (2, 0, 1))[:, None, :, :]  # (Cexp, 1, 3, 3)
    y = jax.lax.conv_general_dilated(
        y, w_oihw, window_strides=(1, 1), padding=((1, 1), (1, 1)),
        dimension_numbers=("NCHW", "OIHW", "NCHW"),
        feature_group_count=Cexp) + params["b_dw"][None, :, None, None]

    y = jnp.transpose(y, (0, 2, 3, 1))                     # NHWC
    y = y.reshape(B, H, W, p, p, D).transpose(0, 1, 3, 2, 4, 5)
    y = y.reshape(B, (H * p) * (W * p), D)

    mu = y.mean(-1, keepdims=True)
    var = ((y - mu) ** 2).mean(-1, keepdims=True)
    y = (y - mu) / jnp.sqrt(var + 1e-5) * params["ln_g"] + params["ln_b"]
    y = y.reshape(B, H * p, W * p, D)

    out = jnp.einsum("bhwd,dk->bhwk", y, params["w_out"]) + params["b_out"]
    return jnp.transpose(out, (0, 3, 1, 2))


# ---------------------------------------------------------------------------
def init_params(key, dim, num_classes):
    Cexp = dim * 16
    ks = jax.random.split(key, 12)
    return {
        "w1": jax.random.normal(ks[0], (dim, Cexp), jnp.float32) * 0.1,
        "b1": jax.random.normal(ks[1], (Cexp,), jnp.float32) * 0.1,
        "bn_gamma": 1.0 + 0.1 * jax.random.normal(ks[2], (Cexp,), jnp.float32),
        "bn_beta": 0.1 * jax.random.normal(ks[3], (Cexp,), jnp.float32),
        "bn_mean": 0.1 * jax.random.normal(ks[4], (Cexp,), jnp.float32),
        "bn_var": jnp.abs(jax.random.normal(ks[5], (Cexp,), jnp.float32)) + 0.5,
        "w_dw": jax.random.normal(ks[6], (9, Cexp), jnp.float32) * 0.1,
        "b_dw": jax.random.normal(ks[7], (Cexp,), jnp.float32) * 0.1,
        "ln_g": 1.0 + 0.1 * jax.random.normal(ks[8], (dim,), jnp.float32),
        "ln_b": 0.1 * jax.random.normal(ks[9], (dim,), jnp.float32),
        "w_out": jax.random.normal(ks[10], (dim, num_classes), jnp.float32) * 0.1,
        "b_out": jax.random.normal(ks[11], (num_classes,), jnp.float32) * 0.1,
    }


if __name__ == "__main__":
    dim = 4
    num_classes = 3
    B, H, W = 2, 16, 16

    key = jax.random.PRNGKey(0)
    k_param, k_x = jax.random.split(key)
    params = init_params(k_param, dim, num_classes)
    x = jax.random.normal(k_x, (B, dim, H, W), jnp.float32)   # PyTorch NCHW input

    # tile_h=8 -> grid (B, 2): exercises the row-tiling + halo path.
    fwd = jax.jit(functools.partial(flkpe_forward, tile_h=8))
    out = jax.block_until_ready(fwd(x, params))

    ref = flkpe_reference(x, params)
    assert out.shape == (B, num_classes, H * 4, W * 4), out.shape
    max_err = float(jnp.max(jnp.abs(out - ref)))
    assert jnp.allclose(out, ref, atol=1e-3, rtol=1e-3), max_err

    print("KERNEL_OK")
</pallas_src>

<mosaic_0001>
module attributes {stable_mosaic.version = 11 : i64} {
  func.func @fused_kernel(%arg0: i32, %arg1: i32, %arg2: memref<1x16x16x4xf32, #tpu.memory_space<vmem>>, %arg3: memref<4x64xf32, #tpu.memory_space<vmem>>, %arg4: memref<1x64xf32, #tpu.memory_space<vmem>>, %arg5: memref<9x64xf32, #tpu.memory_space<vmem>>, %arg6: memref<1x64xf32, #tpu.memory_space<vmem>>, %arg7: memref<64x64xf32, #tpu.memory_space<vmem>>, %arg8: memref<1x64xf32, #tpu.memory_space<vmem>>, %arg9: memref<1x64xf32, #tpu.memory_space<vmem>>, %arg10: memref<64x48xf32, #tpu.memory_space<vmem>>, %arg11: memref<1x48xf32, #tpu.memory_space<vmem>>, %arg12: memref<1x128x48xf32, #tpu.memory_space<vmem>>) attributes {dimension_semantics = [#tpu.dimension_semantics<parallel>, #tpu.dimension_semantics<parallel>], iteration_bounds = array<i64: 2, 2>, scalar_prefetch = 0 : i64, scratch_operands = 0 : i64, tpu.core_type = #tpu.core_type<tc>, window_params = [{transform_indices = @transform_0, window_bounds = array<i64: 1, 16, 16, 4>}, {pipeline_mode = #tpu.pipeline_mode<synchronous>, transform_indices = @transform_1, window_bounds = array<i64: 4, 64>}, {pipeline_mode = #tpu.pipeline_mode<synchronous>, transform_indices = @transform_2, window_bounds = array<i64: 1, 64>}, {pipeline_mode = #tpu.pipeline_mode<synchronous>, transform_indices = @transform_3, window_bounds = array<i64: 9, 64>}, {pipeline_mode = #tpu.pipeline_mode<synchronous>, transform_indices = @transform_4, window_bounds = array<i64: 1, 64>}, {pipeline_mode = #tpu.pipeline_mode<synchronous>, transform_indices = @transform_5, window_bounds = array<i64: 64, 64>}, {pipeline_mode = #tpu.pipeline_mode<synchronous>, transform_indices = @transform_6, window_bounds = array<i64: 1, 64>}, {pipeline_mode = #tpu.pipeline_mode<synchronous>, transform_indices = @transform_7, window_bounds = array<i64: 1, 64>}, {pipeline_mode = #tpu.pipeline_mode<synchronous>, transform_indices = @transform_8, window_bounds = array<i64: 64, 48>}, {pipeline_mode = #tpu.pipeline_mode<synchronous>, transform_indices = @transform_9, window_bounds = array<i64: 1, 48>}, {transform_indices = @transform_10, window_bounds = array<i64: 1, 128, 48>}]} {
    %c8_i32 = arith.constant 8 : i32
    %0 = arith.muli %arg1, %c8_i32 : i32
    %1 = tpu.assume_multiple %0, 8 : i32
    %c0 = arith.constant 0 : index
    %2 = arith.index_cast %1 : i32 to index
    %c0_0 = arith.constant 0 : index
    %c0_1 = arith.constant 0 : index
    %3 = vector.load %arg2[%c0, %2, %c0_0, %c0_1] : memref<1x16x16x4xf32, #tpu.memory_space<vmem>>, vector<1x8x16x4xf32>
    %4 = vector.shape_cast %3 : vector<1x8x16x4xf32> to vector<8x16x4xf32>
    %c1_i32 = arith.constant 1 : i32
    %5 = arith.subi %1, %c1_i32 : i32
    %c0_i32 = arith.constant 0 : i32
    %6 = arith.maxsi %5, %c0_i32 : i32
    %c0_2 = arith.constant 0 : index
    %7 = arith.index_cast %6 : i32 to index
    %c0_3 = arith.constant 0 : index
    %c0_4 = arith.constant 0 : index
    %8 = vector.load %arg2[%c0_2, %7, %c0_3, %c0_4] : memref<1x16x16x4xf32, #tpu.memory_space<vmem>>, vector<1x1x16x4xf32>
    %9 = vector.shape_cast %8 : vector<1x1x16x4xf32> to vector<1x16x4xf32>
    %c8_i32_5 = arith.constant 8 : i32
    %10 = arith.addi %1, %c8_i32_5 : i32
    %c15_i32 = arith.constant 15 : i32
    %11 = arith.minsi %10, %c15_i32 : i32
    %c0_6 = arith.constant 0 : index
    %12 = arith.index_cast %11 : i32 to index
    %c0_7 = arith.constant 0 : index
    %c0_8 = arith.constant 0 : index
    %13 = vector.load %arg2[%c0_6, %12, %c0_7, %c0_8] : memref<1x16x16x4xf32, #tpu.memory_space<vmem>>, vector<1x1x16x4xf32>
    %14 = vector.shape_cast %13 : vector<1x1x16x4xf32> to vector<1x16x4xf32>
    %15 = tpu.concatenate %9, %4, %14 in 0 : vector<1x16x4xf32>, vector<8x16x4xf32>, vector<1x16x4xf32> -> vector<10x16x4xf32>
    %16 = vector.shape_cast %15 : vector<10x16x4xf32> to vector<160x4xf32>
    %c0_9 = arith.constant 0 : index
    %c0_10 = arith.constant 0 : index
    %17 = vector.load %arg3[%c0_9, %c0_10] : memref<4x64xf32, #tpu.memory_space<vmem>>, vector<4x64xf32>
    %cst = arith.constant dense<0.000000e+00> : vector<160x64xf32>
    %18 = tpu.matmul %16, %17, %cst {dimension_numbers = #tpu.dot_dimension_numbers<[1], [0], [0], [1], [0, 0, 1, 1], [], []>} : vector<160x4xf32>, vector<4x64xf32>, vector<160x64xf32> -> vector<160x64xf32>
    %c0_11 = arith.constant 0 : index
    %c0_12 = arith.constant 0 : index
    %19 = vector.load %arg4[%c0_11, %c0_12] : memref<1x64xf32, #tpu.memory_space<vmem>>, vector<1x64xf32>
    %20 = vector.broadcast %19 : vector<1x64xf32> to vector<160x64xf32>
    %21 = arith.addf %18, %20 : vector<160x64xf32>
    %cst_13 = arith.constant 0.000000e+00 : f32
    %22 = vector.broadcast %cst_13 : f32 to vector<160x64xf32>
    %23 = arith.maximumf %21, %22 : vector<160x64xf32>
    %24 = vector.shape_cast %23 : vector<160x64xf32> to vector<10x16x64xf32>
    %c0_i32_14 = arith.constant 0 : i32
    %25 = arith.cmpi sgt, %arg1, %c0_i32_14 : i32
    %26 = arith.extui %25 : i1 to i32
    %27 = arith.sitofp %26 : i32 to f32
    %c1_i32_15 = arith.constant 1 : i32
    %28 = arith.cmpi slt, %arg1, %c1_i32_15 : i32
    %29 = arith.extui %28 : i1 to i32
    %30 = arith.sitofp %29 : i32 to f32
    %31 = vector.extract_strided_slice %24 {offsets = [0, 0, 0], sizes = [1, 16, 64], strides = [1, 1, 1]} : vector<10x16x64xf32> to vector<1x16x64xf32>
    %32 = vector.broadcast %27 : f32 to vector<1x16x64xf32>
    %33 = arith.mulf %31, %32 : vector<1x16x64xf32>
    %34 = vector.extract_strided_slice %24 {offsets = [1, 0, 0], sizes = [8, 16, 64], strides = [1, 1, 1]} : vector<10x16x64xf32> to vector<8x16x64xf32>
    %35 = vector.extract_strided_slice %24 {offsets = [9, 0, 0], sizes = [1, 16, 64], strides = [1, 1, 1]} : vector<10x16x64xf32> to vector<1x16x64xf32>
    %36 = vector.broadcast %30 : f32 to vector<1x16x64xf32>
    %37 = arith.mulf %35, %36 : vector<1x16x64xf32>
    %38 = tpu.concatenate %33, %34, %37 in 0 : vector<1x16x64xf32>, vector<8x16x64xf32>, vector<1x16x64xf32> -> vector<10x16x64xf32>
    %cst_16 = arith.constant 0.000000e+00 : f32
    %39 = vector.broadcast %cst_16 : f32 to vector<10x1x64xf32>
    %40 = vector.extract_strided_slice %38 {offsets = [0, 0, 0], sizes = [10, 15, 64], strides = [1, 1, 1]} : vector<10x16x64xf32> to vector<10x15x64xf32>
    %41 = tpu.concatenate %39, %40 in 1 : vector<10x1x64xf32>, vector<10x15x64xf32> -> vector<10x16x64xf32>
    %42 = vector.extract_strided_slice %38 {offsets = [0, 1, 0], sizes = [10, 15, 64], strides = [1, 1, 1]} : vector<10x16x64xf32> to vector<10x15x64xf32>
    %43 = tpu.concatenate %42, %39 in 1 : vector<10x15x64xf32>, vector<10x1x64xf32> -> vector<10x16x64xf32>
    %cst_17 = arith.constant 0.000000e+00 : f32
    %44 = vector.broadcast %cst_17 : f32 to vector<8x16x64xf32>
    %45 = vector.extract_strided_slice %41 {offsets = [0, 0, 0], sizes = [8, 16, 64], strides = [1, 1, 1]} : vector<10x16x64xf32> to vector<8x16x64xf32>
    %c0_18 = arith.constant 0 : index
    %c0_19 = arith.constant 0 : index
    %46 = vector.load %arg5[%c0_18, %c0_19] : memref<9x64xf32, #tpu.memory_space<vmem>>, vector<1x64xf32>
    %47 = vector.shape_cast %46 : vector<1x64xf32> to vector<64xf32>
    %48 = vector.shape_cast %47 : vector<64xf32> to vector<1x1x64xf32>
    %49 = vector.broadcast %48 : vector<1x1x64xf32> to vector<8x16x64xf32>
    %50 = arith.mulf %45, %49 : vector<8x16x64xf32>
    %51 = arith.addf %44, %50 : vector<8x16x64xf32>
    %52 = vector.extract_strided_slice %38 {offsets = [0, 0, 0], sizes = [8, 16, 64], strides = [1, 1, 1]} : vector<10x16x64xf32> to vector<8x16x64xf32>
    %c1 = arith.constant 1 : index
    %c0_20 = arith.constant 0 : index
    %53 = vector.load %arg5[%c1, %c0_20] : memref<9x64xf32, #tpu.memory_space<vmem>>, vector<1x64xf32>
    %54 = vector.shape_cast %53 : vector<1x64xf32> to vector<64xf32>
    %55 = vector.shape_cast %54 : vector<64xf32> to vector<1x1x64xf32>
    %56 = vector.broadcast %55 : vector<1x1x64xf32> to vector<8x16x64xf32>
    %57 = arith.mulf %52, %56 : vector<8x16x64xf32>
    %58 = arith.addf %51, %57 : vector<8x16x64xf32>
    %59 = vector.extract_strided_slice %43 {offsets = [0, 0, 0], sizes = [8, 16, 64], strides = [1, 1, 1]} : vector<10x16x64xf32> to vector<8x16x64xf32>
    %c2 = arith.constant 2 : index
    %c0_21 = arith.constant 0 : index
    %60 = vector.load %arg5[%c2, %c0_21] : memref<9x64xf32, #tpu.memory_space<vmem>>, vector<1x64xf32>
    %61 = vector.shape_cast %60 : vector<1x64xf32> to vector<64xf32>
    %62 = vector.shape_cast %61 : vector<64xf32> to vector<1x1x64xf32>
    %63 = vector.broadcast %62 : vector<1x1x64xf32> to vector<8x16x64xf32>
    %64 = arith.mulf %59, %63 : vector<8x16x64xf32>
    %65 = arith.addf %58, %64 : vector<8x16x64xf32>
    %66 = vector.extract_strided_slice %41 {offsets = [1, 0, 0], sizes = [8, 16, 64], strides = [1, 1, 1]} : vector<10x16x64xf32> to vector<8x16x64xf32>
    %c3 = arith.constant 3 : index
    %c0_22 = arith.constant 0 : index
    %67 = vector.load %arg5[%c3, %c0_22] : memref<9x64xf32, #tpu.memory_space<vmem>>, vector<1x64xf32>
    %68 = vector.shape_cast %67 : vector<1x64xf32> to vector<64xf32>
    %69 = vector.shape_cast %68 : vector<64xf32> to vector<1x1x64xf32>
    %70 = vector.broadcast %69 : vector<1x1x64xf32> to vector<8x16x64xf32>
    %71 = arith.mulf %66, %70 : vector<8x16x64xf32>
    %72 = arith.addf %65, %71 : vector<8x16x64xf32>
    %73 = vector.extract_strided_slice %38 {offsets = [1, 0, 0], sizes = [8, 16, 64], strides = [1, 1, 1]} : vector<10x16x64xf32> to vector<8x16x64xf32>
    %c4 = arith.constant 4 : index
    %c0_23 = arith.constant 0 : index
    %74 = vector.load %arg5[%c4, %c0_23] : memref<9x64xf32, #tpu.memory_space<vmem>>, vector<1x64xf32>
    %75 = vector.shape_cast %74 : vector<1x64xf32> to vector<64xf32>
    %76 = vector.shape_cast %75 : vector<64xf32> to vector<1x1x64xf32>
    %77 = vector.broadcast %76 : vector<1x1x64xf32> to vector<8x16x64xf32>
    %78 = arith.mulf %73, %77 : vector<8x16x64xf32>
    %79 = arith.addf %72, %78 : vector<8x16x64xf32>
    %80 = vector.extract_strided_slice %43 {offsets = [1, 0, 0], sizes = [8, 16, 64], strides = [1, 1, 1]} : vector<10x16x64xf32> to vector<8x16x64xf32>
    %c5 = arith.constant 5 : index
    %c0_24 = arith.constant 0 : index
    %81 = vector.load %arg5[%c5, %c0_24] : memref<9x64xf32, #tpu.memory_space<vmem>>, vector<1x64xf32>
    %82 = vector.shape_cast %81 : vector<1x64xf32> to vector<64xf32>
    %83 = vector.shape_cast %82 : vector<64xf32> to vector<1x1x64xf32>
    %84 = vector.broadcast %83 : vector<1x1x64xf32> to vector<8x16x64xf32>
    %85 = arith.mulf %80, %84 : vector<8x16x64xf32>
    %86 = arith.addf %79, %85 : vector<8x16x64xf32>
    %87 = vector.extract_strided_slice %41 {offsets = [2, 0, 0], sizes = [8, 16, 64], strides = [1, 1, 1]} : vector<10x16x64xf32> to vector<8x16x64xf32>
    %c6 = arith.constant 6 : index
    %c0_25 = arith.constant 0 : index
    %88 = vector.load %arg5[%c6, %c0_25] : memref<9x64xf32, #tpu.memory_space<vmem>>, vector<1x64xf32>
    %89 = vector.shape_cast %88 : vector<1x64xf32> to vector<64xf32>
    %90 = vector.shape_cast %89 : vector<64xf32> to vector<1x1x64xf32>
    %91 = vector.broadcast %90 : vector<1x1x64xf32> to vector<8x16x64xf32>
    %92 = arith.mulf %87, %91 : vector<8x16x64xf32>
    %93 = arith.addf %86, %92 : vector<8x16x64xf32>
    %94 = vector.extract_strided_slice %38 {offsets = [2, 0, 0], sizes = [8, 16, 64], strides = [1, 1, 1]} : vector<10x16x64xf32> to vector<8x16x64xf32>
    %c7 = arith.constant 7 : index
    %c0_26 = arith.constant 0 : index
    %95 = vector.load %arg5[%c7, %c0_26] : memref<9x64xf32, #tpu.memory_space<vmem>>, vector<1x64xf32>
    %96 = vector.shape_cast %95 : vector<1x64xf32> to vector<64xf32>
    %97 = vector.shape_cast %96 : vector<64xf32> to vector<1x1x64xf32>
    %98 = vector.broadcast %97 : vector<1x1x64xf32> to vector<8x16x64xf32>
    %99 = arith.mulf %94, %98 : vector<8x16x64xf32>
    %100 = arith.addf %93, %99 : vector<8x16x64xf32>
    %101 = vector.extract_strided_slice %43 {offsets = [2, 0, 0], sizes = [8, 16, 64], strides = [1, 1, 1]} : vector<10x16x64xf32> to vector<8x16x64xf32>
    %c8 = arith.constant 8 : index
    %c0_27 = arith.constant 0 : index
    %102 = vector.load %arg5[%c8, %c0_27] : memref<9x64xf32, #tpu.memory_space<vmem>>, vector<1x64xf32>
    %103 = vector.shape_cast %102 : vector<1x64xf32> to vector<64xf32>
    %104 = vector.shape_cast %103 : vector<64xf32> to vector<1x1x64xf32>
    %105 = vector.broadcast %104 : vector<1x1x64xf32> to vector<8x16x64xf32>
    %106 = arith.mulf %101, %105 : vector<8x16x64xf32>
    %107 = arith.addf %100, %106 : vector<8x16x64xf32>
    %c0_28 = arith.constant 0 : index
    %c0_29 = arith.constant 0 : index
    %108 = vector.load %arg6[%c0_28, %c0_29] : memref<1x64xf32, #tpu.memory_space<vmem>>, vector<1x64xf32>
    %109 = vector.shape_cast %108 : vector<1x64xf32> to vector<64xf32>
    %110 = vector.shape_cast %109 : vector<64xf32> to vector<1x1x64xf32>
    %111 = vector.broadcast %110 : vector<1x1x64xf32> to vector<8x16x64xf32>
    %112 = arith.addf %107, %111 : vector<8x16x64xf32>
    %113 = vector.shape_cast %112 : vector<8x16x64xf32> to vector<128x64xf32>
    %c0_30 = arith.constant 0 : index
    %c0_31 = arith.constant 0 : index
    %114 = vector.load %arg7[%c0_30, %c0_31] : memref<64x64xf32, #tpu.memory_space<vmem>>, vector<64x64xf32>
    %cst_32 = arith.constant dense<0.000000e+00> : vector<128x64xf32>
    %115 = tpu.matmul %113, %114, %cst_32 {dimension_numbers = #tpu.dot_dimension_numbers<[1], [0], [0], [1], [0, 0, 1, 1], [], []>} : vector<128x64xf32>, vector<64x64xf32>, vector<128x64xf32> -> vector<128x64xf32>
    %116 = arith.subf %113, %115 : vector<128x64xf32>
    %117 = arith.mulf %116, %116 : vector<128x64xf32>
    %c0_33 = arith.constant 0 : index
    %c0_34 = arith.constant 0 : index
    %118 = vector.load %arg7[%c0_33, %c0_34] : memref<64x64xf32, #tpu.memory_space<vmem>>, vector<64x64xf32>
    %cst_35 = arith.constant dense<0.000000e+00> : vector<128x64xf32>
    %119 = tpu.matmul %117, %118, %cst_35 {dimension_numbers = #tpu.dot_dimension_numbers<[1], [0], [0], [1], [0, 0, 1, 1], [], []>} : vector<128x64xf32>, vector<64x64xf32>, vector<128x64xf32> -> vector<128x64xf32>
    %cst_36 = arith.constant 9.99999974E-6 : f32
    %120 = vector.broadcast %cst_36 : f32 to vector<128x64xf32>
    %121 = arith.addf %119, %120 : vector<128x64xf32>
    %122 = math.rsqrt %121 : vector<128x64xf32>
    %123 = arith.mulf %116, %122 : vector<128x64xf32>
    %c0_37 = arith.constant 0 : index
    %c0_38 = arith.constant 0 : index
    %124 = vector.load %arg8[%c0_37, %c0_38] : memref<1x64xf32, #tpu.memory_space<vmem>>, vector<1x64xf32>
    %125 = vector.broadcast %124 : vector<1x64xf32> to vector<128x64xf32>
    %126 = arith.mulf %123, %125 : vector<128x64xf32>
    %c0_39 = arith.constant 0 : index
    %c0_40 = arith.constant 0 : index
    %127 = vector.load %arg9[%c0_39, %c0_40] : memref<1x64xf32, #tpu.memory_space<vmem>>, vector<1x64xf32>
    %128 = vector.broadcast %127 : vector<1x64xf32> to vector<128x64xf32>
    %129 = arith.addf %126, %128 : vector<128x64xf32>
    %c0_41 = arith.constant 0 : index
    %c0_42 = arith.constant 0 : index
    %130 = vector.load %arg10[%c0_41, %c0_42] : memref<64x48xf32, #tpu.memory_space<vmem>>, vector<64x48xf32>
    %cst_43 = arith.constant dense<0.000000e+00> : vector<128x48xf32>
    %131 = tpu.matmul %129, %130, %cst_43 {dimension_numbers = #tpu.dot_dimension_numbers<[1], [0], [0], [1], [0, 0, 1, 1], [], []>} : vector<128x64xf32>, vector<64x48xf32>, vector<128x48xf32> -> vector<128x48xf32>
    %c0_44 = arith.constant 0 : index
    %c0_45 = arith.constant 0 : index
    %132 = vector.load %arg11[%c0_44, %c0_45] : memref<1x48xf32, #tpu.memory_space<vmem>>, vector<1x48xf32>
    %133 = vector.broadcast %132 : vector<1x48xf32> to vector<128x48xf32>
    %134 = arith.addf %131, %133 : vector<128x48xf32>
    %c0_46 = arith.constant 0 : index
    %c0_47 = arith.constant 0 : index
    %c0_48 = arith.constant 0 : index
    %135 = vector.load %arg12[%c0_46, %c0_47, %c0_48] : memref<1x128x48xf32, #tpu.memory_space<vmem>>, vector<1x128x48xf32>
    %136 = vector.shape_cast %135 : vector<1x128x48xf32> to vector<128x48xf32>
    %137 = vector.shape_cast %134 : vector<128x48xf32> to vector<1x128x48xf32>
    tpu.vector_store %arg12[%c0_46, %c0_47, %c0_48], %137 {strides = array<i32>} : memref<1x128x48xf32, #tpu.memory_space<vmem>>, vector<1x128x48xf32>,
    return
  }
  func.func @transform_0(%arg0: i32, %arg1: i32) -> (i32, i32, i32, i32) {
    %c0_i32 = arith.constant 0 : i32
    %c0_i32_0 = arith.constant 0 : i32
    %c0_i32_1 = arith.constant 0 : i32
    %c0_i32_2 = arith.constant 0 : i32
    return %arg0, %c0_i32, %c0_i32_0, %c0_i32_1 : i32, i32, i32, i32
  }
  func.func @transform_1(%arg0: i32, %arg1: i32) -> (i32, i32) {
    %c0_i32 = arith.constant 0 : i32
    %c0_i32_0 = arith.constant 0 : i32
    %c0_i32_1 = arith.constant 0 : i32
    return %c0_i32, %c0_i32_0 : i32, i32
  }
  func.func @transform_2(%arg0: i32, %arg1: i32) -> (i32, i32) {
    %c0_i32 = arith.constant 0 : i32
    %c0_i32_0 = arith.constant 0 : i32
    %c0_i32_1 = arith.constant 0 : i32
    return %c0_i32, %c0_i32_0 : i32, i32
  }
  func.func @transform_3(%arg0: i32, %arg1: i32) -> (i32, i32) {
    %c0_i32 = arith.constant 0 : i32
    %c0_i32_0 = arith.constant 0 : i32
    %c0_i32_1 = arith.constant 0 : i32
    return %c0_i32, %c0_i32_0 : i32, i32
  }
  func.func @transform_4(%arg0: i32, %arg1: i32) -> (i32, i32) {
    %c0_i32 = arith.constant 0 : i32
    %c0_i32_0 = arith.constant 0 : i32
    %c0_i32_1 = arith.constant 0 : i32
    return %c0_i32, %c0_i32_0 : i32, i32
  }
  func.func @transform_5(%arg0: i32, %arg1: i32) -> (i32, i32) {
    %c0_i32 = arith.constant 0 : i32
    %c0_i32_0 = arith.constant 0 : i32
    %c0_i32_1 = arith.constant 0 : i32
    return %c0_i32, %c0_i32_0 : i32, i32
  }
  func.func @transform_6(%arg0: i32, %arg1: i32) -> (i32, i32) {
    %c0_i32 = arith.constant 0 : i32
    %c0_i32_0 = arith.constant 0 : i32
    %c0_i32_1 = arith.constant 0 : i32
    return %c0_i32, %c0_i32_0 : i32, i32
  }
  func.func @transform_7(%arg0: i32, %arg1: i32) -> (i32, i32) {
    %c0_i32 = arith.constant 0 : i32
    %c0_i32_0 = arith.constant 0 : i32
    %c0_i32_1 = arith.constant 0 : i32
    return %c0_i32, %c0_i32_0 : i32, i32
  }
  func.func @transform_8(%arg0: i32, %arg1: i32) -> (i32, i32) {
    %c0_i32 = arith.constant 0 : i32
    %c0_i32_0 = arith.constant 0 : i32
    %c0_i32_1 = arith.constant 0 : i32
    return %c0_i32, %c0_i32_0 : i32, i32
  }
  func.func @transform_9(%arg0: i32, %arg1: i32) -> (i32, i32) {
    %c0_i32 = arith.constant 0 : i32
    %c0_i32_0 = arith.constant 0 : i32
    %c0_i32_1 = arith.constant 0 : i32
    return %c0_i32, %c0_i32_0 : i32, i32
  }
  func.func @transform_10(%arg0: i32, %arg1: i32) -> (i32, i32, i32) {
    %c0_i32 = arith.constant 0 : i32
    %c0_i32_0 = arith.constant 0 : i32
    return %arg0, %arg1, %c0_i32 : i32, i32, i32
  }
}

</mosaic_0001>

<bundles_post_ra>
// kernel: tile.26
= control target key start
LH: loop header
LB: loop body
LE: loop exit
PB: predicated region body
PF: predicated region fallthrough
CT: control target
= control target key end

     0   :  { %2 = vsyncpa [#allocation1], 0  ;;  %s45_s6 = smov [#allocation0]   ;;  %s65_s0 = inlined_call_operand.hbm [shape: f32[3], index: 0, kind: input, shape index: {}]   ;;  %s66_s1 = inlined_call_operand.vmem [shape: f32[16,3], index: 1, kind: output, shape index: {}]  }
   0x1   :  { %s9_s7 = sshll.u32 %s45_s6, 4  ;;  %s10_s7 = int_to_ptr.vmem [resolvable:$true] %s9_s7 }
   0x2   :  { %s31_s8 = scalar_lea.vmem %s10_s7, 16  ;;  %s35_s9 = scalar_lea.vmem %s10_s7, 32 }
   0x3   :  { %p32_p0 = scmp.ne.s32.totalorder %s10_s7, %s31_s8  ;;  %p36_p1 = scmp.lt.s32.totalorder %s10_s7, %s10_s7 }
   0x4   :  { %p37_p2 = scmp.lt.s32.totalorder %s35_s9, %s31_s8 }
   0x6   :  { %p38_p3 = por %p37_p2, %p36_p1 }
   0x8   :  { %p39_p4 = pnand %p38_p3, %p32_p0 }
   0xa   :  { %42 = shalt.err (!%p39_p4)
}
   0xb   :  { %12 = dma.hbm_to_vmem [thread:$0]  %s65_s0, 16, %s10_s7, [#allocation1]  }
   0xc   :  { %43 = dma.done.wait [#allocation1], 16  }
   0xd   :  { %44 = vsyncadd [#allocation1], 4294967280  ;;  %v16_v0 = vld [vmem:[#allocation0] ss:$0 sm:$0xff] }
   0xe   :  { %17 = vst [vmem:[%s66_s1] sm:$0xff] %v16_v0  ;;  %21 = vst [vmem:[%s66_s1 + $0x8] sm:$0xff] %v16_v0 }
   0xf   :  { %20 = vsyncpa [#allocation1], 1 }

// kernel: tile.22
= control target key start
LH: loop header
LB: loop body
LE: loop exit
PB: predicated region body
PF: predicated region fallthrough
CT: control target
= control target key end

     0   :  { %2 = vsyncpa [#allocation1], 0  ;;  %s45_s6 = smov [#allocation0]   ;;  %s65_s0 = inlined_call_operand.hbm [shape: f32[4], index: 0, kind: input, shape index: {}]   ;;  %s66_s1 = inlined_call_operand.vmem [shape: f32[16,4], index: 1, kind: output, shape index: {}]  }
   0x1   :  { %s9_s7 = sshll.u32 %s45_s6, 4  ;;  %s10_s7 = int_to_ptr.vmem [resolvable:$true] %s9_s7 }
   0x2   :  { %s31_s8 = scalar_lea.vmem %s10_s7, 16  ;;  %s35_s9 = scalar_lea.vmem %s10_s7, 32 }
   0x3   :  { %p32_p0 = scmp.ne.s32.totalorder %s10_s7, %s31_s8  ;;  %p36_p1 = scmp.lt.s32.totalorder %s10_s7, %s10_s7 }
   0x4   :  { %p37_p2 = scmp.lt.s32.totalorder %s35_s9, %s31_s8 }
   0x6   :  { %p38_p3 = por %p37_p2, %p36_p1 }
   0x8   :  { %p39_p4 = pnand %p38_p3, %p32_p0 }
   0xa   :  { %42 = shalt.err (!%p39_p4)
}
   0xb   :  { %12 = dma.hbm_to_vmem [thread:$0]  %s65_s0, 16, %s10_s7, [#allocation1]  }
   0xc   :  { %43 = dma.done.wait [#allocation1], 16  }
   0xd   :  { %44 = vsyncadd [#allocation1], 4294967280  ;;  %v16_v0 = vld [vmem:[#allocation0] ss:$0 sm:$0xff] }
   0xe   :  { %17 = vst [vmem:[%s66_s1] sm:$0xff] %v16_v0  ;;  %21 = vst [vmem:[%s66_s1 + $0x8] sm:$0xff] %v16_v0 }
   0xf   :  { %20 = vsyncpa [#allocation1], 1 }

// kernel: tile.29
= control target key start
LH: loop header
LB: loop body
LE: loop exit
PB: predicated region body
PF: predicated region fallthrough
CT: control target
= control target key end

     0   :  { %s133_s10 = smov 45   ;;  %s134_s11 = smov 39   ;;  %vm3_vm0 = vcmask 23552   ;;  %vm9_vm1 = vcmask 392552   ;;  %vm15_vm2 = vcmask 367952   ;;  %vm21_vm3 = vcmask 343352   ;;  %s209_s0 = inlined_call_operand.vmem [shape: f32[16,3], index: 0, kind: input, shape index: {}]   ;;  %s210_s1 = inlined_call_operand.vmem [shape: f32[1,48], index: 1, kind: output, shape index: {}]  }
   0x1   :  { %v103_v0 = vld [vmem:[%s209_s0 + $0xf] sm:$0x1]   ;;  %v105_v1 = vld [vmem:[%s209_s0 + $0xd] sm:$0x1]   ;;  %v104_v2 = vld [vmem:[%s209_s0 + $0xe] sm:$0x1]  }
   0x2   :  { %7 = vrot.lane.b32.xlu0 %v103_v0, %s133_s10  ;;  %19 = vrot.lane.b32.xlu1 %v105_v1, %s134_s11  ;;  %v106_v3 = vld [vmem:[%s209_s0 + $0xc] sm:$0x1]   ;;  %s135_s16 = smov 42   ;;  %s136_s17 = smov 36   ;;  %v107_v4 = vld [vmem:[%s209_s0 + $0xb] sm:$0x1]  }
   0x3   :  { %v108_v5 = vld [vmem:[%s209_s0 + $0xa] sm:$0x1]   ;;  %v2_v6 = vld [vmem:[%s209_s0] sm:$0x1]   ;;  %s137_s24 = smov 33   ;;  %s138_s25 = smov 30  }
   0x4   :  { %4 = vst.msk [vmem:[#allocation0] sm:$0x1] %vm3_vm0, %v2_v6   ;;  %v109_v7 = vld [vmem:[%s209_s0 + $0x9] sm:$0x1]   ;;  %v110_v8 = vld [vmem:[%s209_s0 + $0x8] sm:$0x1]  }
   0x5   :  { %s139_s30 = smov 27   ;;  %s140_s2 = smov 24   ;;  %v111_v9 = vld [vmem:[%s209_s0 + $0x7] sm:$0x1]   ;;  %v112_v10 = vld [vmem:[%s209_s0 + $0x6] sm:$0x1]  }
   0x6   :  { %13 = vrot.lane.b32.xlu0 %v104_v2, %s135_s16  ;;  %25 = vrot.lane.b32.xlu1 %v106_v3, %s136_s17  ;;  %s141_s7 = smov 21   ;;  %s142_s8 = smov 18   ;;  %v113_v11 = vld [vmem:[%s209_s0 + $0x5] sm:$0x1]   ;;  %v114_v12 = vld [vmem:[%s209_s0 + $0x4] sm:$0x1]  }
   0x7   :  { %s143_s13 = smov 15   ;;  %s144_s14 = smov 12   ;;  %v115_v13 = vld [vmem:[%s209_s0 + $0x3] sm:$0x1]   ;;  %v116_v14 = vld [vmem:[%s209_s0 + $0x2] sm:$0x1]  }
   0x8   :  { %s145_s19 = smov 9   ;;  %s146_s20 = smov 6   ;;  %v117_v15 = vld [vmem:[%s209_s0 + $0x1] sm:$0x1]   ;;  %vm27_vm4 = vcmask 318752   ;;  %vm33_vm5 = vcmask 294152  }
   0x9   :  { %s147_s0 = smov 3   ;;  %vm39_vm6 = vcmask 269552   ;;  %vm45_vm7 = vcmask 244952   ;;  %vm51_vm8 = vcmask 220352   ;;  %vm57_vm9 = vcmask 195752  }
   0xa   :  { %31 = vrot.lane.b32.xlu0 %v107_v4, %s137_s24  ;;  %37 = vrot.lane.b32.xlu1 %v108_v5, %s138_s25  ;;  %vm63_vm10 = vcmask 171152   ;;  %vm69_vm11 = vcmask 146552   ;;  %vm75_vm12 = vcmask 121952   ;;  %vm81_vm13 = vcmask 97352  }
   0xb   :  { %vm87_vm14 = vcmask 72752   ;;  %vm93_vm15 = vcmask 48152  }
   0xe   :  { %43 = vrot.lane.b32.xlu0 %v109_v7, %s139_s30  ;;  %49 = vrot.lane.b32.xlu1 %v110_v8, %s140_s2 }
  0x12   :  { %55 = vrot.lane.b32.xlu0 %v111_v9, %s141_s7  ;;  %61 = vrot.lane.b32.xlu1 %v112_v10, %s142_s8 }
  0x16   :  { %67 = vrot.lane.b32.xlu0 %v113_v11, %s143_s13  ;;  %73 = vrot.lane.b32.xlu1 %v114_v12, %s144_s14 }
  0x1a   :  { %79 = vrot.lane.b32.xlu0 %v115_v13, %s145_s19  ;;  %85 = vrot.lane.b32.xlu1 %v116_v14, %s146_s20 }
  0x1e   :  { %91 = vrot.lane.b32.xlu0 %v117_v15, %s147_s0 }
  0x74   :  { %v8_v16 = vpop.permute.xlu0 %7   ;;  %v20_v17 = vpop.permute.xlu1 %19  }
  0x75   :  { %10 = vst.msk [vmem:[#allocation0] sm:$0x1] %vm9_vm1, %v8_v16  }
  0x78   :  { %v14_v18 = vpop.permute.xlu0 %13   ;;  %v26_v19 = vpop.permute.xlu1 %25  }
  0x79   :  { %16 = vst.msk [vmem:[#allocation0] sm:$0x1] %vm15_vm2, %v14_v18  }
  0x7a   :  { %22 = vst.msk [vmem:[#allocation0] sm:$0x1] %vm21_vm3, %v20_v17  }
  0x7b   :  { %28 = vst.msk [vmem:[#allocation0] sm:$0x1] %vm27_vm4, %v26_v19  }
  0x7c   :  { %v32_v20 = vpop.permute.xlu0 %31   ;;  %v38_v21 = vpop.permute.xlu1 %37  }
  0x7d   :  { %34 = vst.msk [vmem:[#allocation0] sm:$0x1] %vm33_vm5, %v32_v20  }
  0x7e   :  { %40 = vst.msk [vmem:[#allocation0] sm:$0x1] %vm39_vm6, %v38_v21  }
  0x80   :  { %v44_v22 = vpop.permute.xlu0 %43   ;;  %v50_v23 = vpop.permute.xlu1 %49  }
  0x81   :  { %46 = vst.msk [vmem:[#allocation0] sm:$0x1] %vm45_vm7, %v44_v22  }
  0x82   :  { %52 = vst.msk [vmem:[#allocation0] sm:$0x1] %vm51_vm8, %v50_v23  }
  0x84   :  { %v56_v24 = vpop.permute.xlu0 %55   ;;  %v62_v25 = vpop.permute.xlu1 %61  }
  0x85   :  { %58 = vst.msk [vmem:[#allocation0] sm:$0x1] %vm57_vm9, %v56_v24  }
  0x86   :  { %64 = vst.msk [vmem:[#allocation0] sm:$0x1] %vm63_vm10, %v62_v25  }
  0x88   :  { %v68_v26 = vpop.permute.xlu0 %67   ;;  %v74_v27 = vpop.permute.xlu1 %73  }
  0x89   :  { %70 = vst.msk [vmem:[#allocation0] sm:$0x1] %vm69_vm11, %v68_v26  }
  0x8a   :  { %76 = vst.msk [vmem:[#allocation0] sm:$0x1] %vm75_vm12, %v74_v27  }
  0x8c   :  { %v80_v28 = vpop.permute.xlu0 %79   ;;  %v86_v29 = vpop.permute.xlu1 %85  }
  0x8d   :  { %82 = vst.msk [vmem:[#allocation0] sm:$0x1] %vm81_vm13, %v80_v28  }
  0x8e   :  { %88 = vst.msk [vmem:[#allocation0] sm:$0x1] %vm87_vm14, %v86_v29  }
  0x90   :  { %v92_v30 = vpop.permute.xlu0 %91  }
  0x91   :  { %94 = vst.msk [vmem:[#allocation0] sm:$0x1] %vm93_vm15, %v92_v30  }
  0x98   :  { %v99_v31 = vld [vmem:[#allocation0] sm:$0x1] }
  0x99   :  { %102 = vst [vmem:[%s210_s1] sm:$0x1] %v99_v31 }

// kernel: tile.28
= control target key start
LH: loop header
LB: loop body
LE: loop exit
PB: predicated region body
PF: predicated region fallthrough
CT: control target
= control target key end

     0   :  { %s133_s10 = smov 60   ;;  %s134_s11 = smov 52   ;;  %vm3_vm0 = vcmask 31744   ;;  %vm9_vm1 = vcmask 523744   ;;  %vm15_vm2 = vcmask 490944   ;;  %vm21_vm3 = vcmask 458144   ;;  %s209_s0 = inlined_call_operand.vmem [shape: f32[16,4], index: 0, kind: input, shape index: {}]   ;;  %s210_s1 = inlined_call_operand.vmem [shape: f32[1,64], index: 1, kind: output, shape index: {}]  }
   0x1   :  { %v103_v0 = vld [vmem:[%s209_s0 + $0xf] sm:$0x1]   ;;  %v105_v1 = vld [vmem:[%s209_s0 + $0xd] sm:$0x1]   ;;  %v104_v2 = vld [vmem:[%s209_s0 + $0xe] sm:$0x1]  }
   0x2   :  { %7 = vrot.lane.b32.xlu0 %v103_v0, %s133_s10  ;;  %19 = vrot.lane.b32.xlu1 %v105_v1, %s134_s11  ;;  %v106_v3 = vld [vmem:[%s209_s0 + $0xc] sm:$0x1]   ;;  %s135_s16 = smov 56   ;;  %s136_s17 = smov 48   ;;  %v107_v4 = vld [vmem:[%s209_s0 + $0xb] sm:$0x1]  }
   0x3   :  { %v108_v5 = vld [vmem:[%s209_s0 + $0xa] sm:$0x1]   ;;  %v2_v6 = vld [vmem:[%s209_s0] sm:$0x1]   ;;  %s137_s24 = smov 44   ;;  %s138_s25 = smov 40  }
   0x4   :  { %4 = vst.msk [vmem:[#allocation0] sm:$0x1] %vm3_vm0, %v2_v6   ;;  %v109_v7 = vld [vmem:[%s209_s0 + $0x9] sm:$0x1]   ;;  %v110_v8 = vld [vmem:[%s209_s0 + $0x8] sm:$0x1]  }
   0x5   :  { %s139_s30 = smov 36   ;;  %s140_s2 = smov 32   ;;  %v111_v9 = vld [vmem:[%s209_s0 + $0x7] sm:$0x1]   ;;  %v112_v10 = vld [vmem:[%s209_s0 + $0x6] sm:$0x1]  }
   0x6   :  { %13 = vrot.lane.b32.xlu0 %v104_v2, %s135_s16  ;;  %25 = vrot.lane.b32.xlu1 %v106_v3, %s136_s17  ;;  %s141_s7 = smov 28   ;;  %s142_s8 = smov 24   ;;  %v113_v11 = vld [vmem:[%s209_s0 + $0x5] sm:$0x1]   ;;  %v114_v12 = vld [vmem:[%s209_s0 + $0x4] sm:$0x1]  }
   0x7   :  { %s143_s13 = smov 20   ;;  %s144_s14 = smov 16   ;;  %v115_v13 = vld [vmem:[%s209_s0 + $0x3] sm:$0x1]   ;;  %v116_v14 = vld [vmem:[%s209_s0 + $0x2] sm:$0x1]  }
   0x8   :  { %s145_s19 = smov 12   ;;  %s146_s20 = smov 8   ;;  %v117_v15 = vld [vmem:[%s209_s0 + $0x1] sm:$0x1]   ;;  %vm27_vm4 = vcmask 425344   ;;  %vm33_vm5 = vcmask 392544  }
   0x9   :  { %s147_s0 = smov 4   ;;  %vm39_vm6 = vcmask 359744   ;;  %vm45_vm7 = vcmask 326944   ;;  %vm51_vm8 = vcmask 294144   ;;  %vm57_vm9 = vcmask 261344  }
   0xa   :  { %31 = vrot.lane.b32.xlu0 %v107_v4, %s137_s24  ;;  %37 = vrot.lane.b32.xlu1 %v108_v5, %s138_s25  ;;  %vm63_vm10 = vcmask 228544   ;;  %vm69_vm11 = vcmask 195744   ;;  %vm75_vm12 = vcmask 162944   ;;  %vm81_vm13 = vcmask 130144  }
   0xb   :  { %vm87_vm14 = vcmask 97344   ;;  %vm93_vm15 = vcmask 64544  }
   0xe   :  { %43 = vrot.lane.b32.xlu0 %v109_v7, %s139_s30  ;;  %49 = vrot.lane.b32.xlu1 %v110_v8, %s140_s2 }
  0x12   :  { %55 = vrot.lane.b32.xlu0 %v111_v9, %s141_s7  ;;  %61 = vrot.lane.b32.xlu1 %v112_v10, %s142_s8 }
  0x16   :  { %67 = vrot.lane.b32.xlu0 %v113_v11, %s143_s13  ;;  %73 = vrot.lane.b32.xlu1 %v114_v12, %s144_s14 }
  0x1a   :  { %79 = vrot.lane.b32.xlu0 %v115_v13, %s145_s19  ;;  %85 = vrot.lane.b32.xlu1 %v116_v14, %s146_s20 }
  0x1e   :  { %91 = vrot.lane.b32.xlu0 %v117_v15, %s147_s0 }
  0x74   :  { %v8_v16 = vpop.permute.xlu0 %7   ;;  %v20_v17 = vpop.permute.xlu1 %19  }
  0x75   :  { %10 = vst.msk [vmem:[#allocation0] sm:$0x1] %vm9_vm1, %v8_v16  }
  0x78   :  { %v14_v18 = vpop.permute.xlu0 %13   ;;  %v26_v19 = vpop.permute.xlu1 %25  }
  0x79   :  { %16 = vst.msk [vmem:[#allocation0] sm:$0x1] %vm15_vm2, %v14_v18  }
  0x7a   :  { %22 = vst.msk [vmem:[#allocation0] sm:$0x1] %vm21_vm3, %v20_v17  }
  0x7b   :  { %28 = vst.msk [vmem:[#allocation0] sm:$0x1] %vm27_vm4, %v26_v19  }
  0x7c   :  { %v32_v20 = vpop.permute.xlu0 %31   ;;  %v38_v21 = vpop.permute.xlu1 %37  }
  0x7d   :  { %34 = vst.msk [vmem:[#allocation0] sm:$0x1] %vm33_vm5, %v32_v20  }
  0x7e   :  { %40 = vst.msk [vmem:[#allocation0] sm:$0x1] %vm39_vm6, %v38_v21  }
  0x80   :  { %v44_v22 = vpop.permute.xlu0 %43   ;;  %v50_v23 = vpop.permute.xlu1 %49  }
  0x81   :  { %46 = vst.msk [vmem:[#allocation0] sm:$0x1] %vm45_vm7, %v44_v22  }
  0x82   :  { %52 = vst.msk [vmem:[#allocation0] sm:$0x1] %vm51_vm8, %v50_v23  }
  0x84   :  { %v56_v24 = vpop.permute.xlu0 %55   ;;  %v62_v25 = vpop.permute.xlu1 %61  }
  0x85   :  { %58 = vst.msk [vmem:[#allocation0] sm:$0x1] %vm57_vm9, %v56_v24  }
  0x86   :  { %64 = vst.msk [vmem:[#allocation0] sm:$0x1] %vm63_vm10, %v62_v25  }
  0x88   :  { %v68_v26 = vpop.permute.xlu0 %67   ;;  %v74_v27 = vpop.permute.xlu1 %73  }
  0x89   :  { %70 = vst.msk [vmem:[#allocation0] sm:$0x1] %vm69_vm11, %v68_v26  }
  0x8a   :  { %76 = vst.msk [vmem:[#allocation0] sm:$0x1] %vm75_vm12, %v74_v27  }
  0x8c   :  { %v80_v28 = vpop.permute.xlu0 %79   ;;  %v86_v29 = vpop.permute.xlu1 %85  }
  0x8d   :  { %82 = vst.msk [vmem:[#allocation0] sm:$0x1] %vm81_vm13, %v80_v28  }
  0x8e   :  { %88 = vst.msk [vmem:[#allocation0] sm:$0x1] %vm87_vm14, %v86_v29  }
  0x90   :  { %v92_v30 = vpop.permute.xlu0 %91  }
  0x91   :  { %94 = vst.msk [vmem:[#allocation0] sm:$0x1] %vm93_vm15, %v92_v30  }
  0x98   :  { %v99_v31 = vld [vmem:[#allocation0] sm:$0x1] }
  0x99   :  { %102 = vst [vmem:[%s210_s1] sm:$0x1] %v99_v31 }

// kernel: flkpe_forward.1
= control target key start
LH: loop header
LB: loop body
LE: loop exit
PB: predicated region body
PF: predicated region fallthrough
CT: control target
= control target key end

     0   :  { %15 = vsyncpa [#allocation3], 0  ;;  %s3745_s0 = inlined_call_operand.vmem [shape: f32[2,16,16,4], index: 0, kind: input, shape index: {}]   ;;  %s3746_s1 = inlined_call_operand.vmem [shape: f32[4,64], index: 1, kind: input, shape index: {}]   ;;  %s3747_s2 = inlined_call_operand.vmem [shape: f32[1,64], index: 2, kind: input, shape index: {}]   ;;  %s3748_s3 = inlined_call_operand.hbm [shape: f32[9,64], index: 3, kind: input, shape index: {}]   ;;  %s3749_s4 = inlined_call_operand.hbm [shape: f32[1,64], index: 4, kind: input, shape index: {}]   ;;  %s3750_s5 = inlined_call_operand.vmem [shape: f32[64,64], index: 5, kind: input, shape index: {}]   ;;  %s3751_s6 = inlined_call_operand.vmem [shape: f32[1,64], index: 6, kind: input, shape index: {}]   ;;  %s3752_s7 = inlined_call_operand.vmem [shape: f32[1,64], index: 7, kind: input, shape index: {}]   ;;  %s3753_s8 = inlined_call_operand.vmem [shape: f32[64,48], index: 8, kind: input, shape index: {}]   ;;  %s3754_s9 = inlined_call_operand.vmem [shape: f32[1,48], index: 9, kind: input, shape index: {}]   ;;  %s3755_s10 = inlined_call_operand.vmem [shape: f32[2,256,48], index: 10, kind: output, shape index: {}]  }
   0x1   :  { %16 = vsyncpa [#allocation5], 0  ;;  %s2659_s13 = smov 0   ;;  %s2661_s14 = smov 0  }
   0x2   :  { %s2663_s15 = smov 0   ;;  %s2665_s16 = smov 0  }
   0x3   :  { %s2667_s17 = smov 0  }
   0x4 LB: > { %s2054_s18 = sadd.s32 4294967295, %s2598_s17   ;;  %s31_s19 = sadd.s32 1, %s2590_s15  ;;  %s2598_s17 = sphi %s2667_s17, %s22_s17   ;;  %s2594_s16 = sphi %s2665_s16, %s3844_s16   ;;  %s2590_s15 = sphi %s2663_s15, %s3843_s15   ;;  %s2586_s14 = sphi %s2661_s14, %s3842_s14   ;;  %s2582_s13 = sphi %s2659_s13, %s3841_s13  }
   0x5   : > { %p32_p0 = scmp.ge.s32.totalorder %s31_s19, 2  ;;  %s34_s20 = sadd.s32 1, %s2594_s16 }
   0x6   : > { %p2056_p1 = scmp.ge.s32.totalorder %s2598_s17, 1  ;;  %p282_p2 = scmp.lt.s32.totalorder %s2598_s17, 5 }
   0x7   : > { %s3846_s19 = smov (%p32_p0, %s31_s19), 0  ;;  %s3848_s20 = smov (!%p32_p0, %s34_s20), %s2594_s16 }
   0x8   : > { %p2692_p3 = pnand %p2056_p1, %p282_p2  ;;  %p36_p4 = scmp.ge.s32.totalorder %s3848_s20, 2 }
   0x9   : > { %p2696_p5 = scmp.eq.s32.totalorder %s2054_s18, 0  ;;  %s2600_s23 = smov [#allocation2]  }
   0xa   : > { %p2413_p6 = pneg %p2692_p3  ;;  %s3850_s20 = smov (%p36_p4, %s3848_s20), 0 }
   0xb   : > { %s300_s24 = sshll.u32 %s2600_s23, 4  ;;  %s301_s24 = int_to_ptr.vmem [resolvable:$true] %s300_s24 }
   0xc   : > { %p2706_p7 = pnand %p2696_p5, %p2413_p6  ;;  %s2511_s26 = scalar_lea.vmem %s301_s24, 256 }
   0xd   : > { %p2512_p9 = scmp.ne.s32.totalorder %s301_s24, %s2511_s26  ;;  %p2519_p12 = scmp.lt.s32.totalorder %s301_s24, %s301_s24 }
   0xe   : > { %p2502_p8 = pneg %p2706_p7  ;;  %p2520_p13 = scmp.lt.s32.totalorder %s2511_s26, %s2511_s26 }
  0x10   : > { %p2514_p10 = pnand %p2512_p9, %p2502_p8  ;;  %p2521_p0 = por %p2520_p13, %p2519_p12 }
  0x12   : > { %p2515_p11 = pneg %p2514_p10 }
  0x14   : > { %p2522_p1 = pnand %p2521_p0, %p2515_p11 }
  0x16   : > { %2525 = shalt.err (!%p2522_p1)
}
  0x17   : > { %s2601_s27 = smov 128   ;;  %s2602_s28 = smov 8  }
  0x18   : > { %2416 = dma.hbm_to_vmem [thread:$0]  (!%p2706_p7), %s3748_s3, 256, %s301_s24, [#allocation3], %s2601_s27, %s2601_s27, %s2602_s28  }
  0x19   : > { %s2603_s11 = smov [#allocation4]  }
  0x1a   : > { %s314_s12 = sshll.u32 %s2603_s11, 4  ;;  %s315_s12 = int_to_ptr.vmem [resolvable:$true] %s314_s12 }
  0x1b   : > { %s2537_s18 = scalar_lea.vmem %s315_s12, 16  ;;  %s2544_s23 = scalar_lea.vmem %s315_s12, 32 }
  0x1c   : > { %p2538_p2 = scmp.ne.s32.totalorder %s315_s12, %s2537_s18  ;;  %p2545_p9 = scmp.lt.s32.totalorder %s315_s12, %s315_s12 }
  0x1d   : > { %p2546_p10 = scmp.lt.s32.totalorder %s2544_s23, %s2537_s18 }
  0x1e   : > { %p2540_p4 = pnand %p2538_p2, %p2502_p8 }
  0x1f   : > { %p2547_p11 = por %p2546_p10, %p2545_p9 }
  0x20   : > { %p2541_p6 = pneg %p2540_p4 }
  0x22   : > { %p2548_p12 = pnand %p2547_p11, %p2541_p6 }
  0x24   : > { %2551 = shalt.err (!%p2548_p12)
}
  0x25   : > { %2419 = dma.hbm_to_vmem [thread:$0]  (!%p2706_p7), %s3749_s4, 16, %s315_s12, [#allocation5]  }
  0x26   : > { %350 = sbr.rel (%p2692_p3) target bundleno = 984 (0x3d8), region = 60 }
  0x2b   : > { %2573 = dma.done.wait (%p2696_p5), [#allocation3], 256  }
  0x2c   : > { %2575 = vsyncadd (%p2696_p5), [#allocation3], 4294967040 }
  0x2d   : > { %2577 = dma.done.wait (%p2696_p5), [#allocation5], 16  }
  0x2e   : > { %2579 = vsyncadd (%p2696_p5), [#allocation5], 4294967280  ;;  %p396_p7 = scmp.lt.s32.totalorder %s2586_s14, 1  ;;  %vm513_vm0 = vcmask 1043456   ;;  %s2068_s21 = sshll.u32 %s2582_s13, 3  ;;  %vm452_vm1 = vcmask 31744  }
  0x2f   : > { %v444_v0 = vld [vmem:[%s3746_s1] sm:$0xf]  ;;  %s2070_s22 = sadd.s32 4294967295, %s2068_s21  ;;  %s2159_s28 = sshll.u32 %s2582_s13, 7  ;;  %v1219_v21 = vld [vmem:[%s3750_s5 + $0x38] sm:$0xff]  ;;  %v1218_v22 = vld [vmem:[%s3750_s5 + $0x30] sm:$0xff] }
  0x30   : > { %s3852_s14 = smov (!%p396_p7, %s2586_s14), 1  ;;  %2253 = vmatprep.subr.msk.mxu0 %vm513_vm0, %v444_v0  ;;  %p431_p3 = scmp.gt.s32.totalorder %s2070_s22, 0  ;;  %2285 = vmatprep.subr.mxu1 %v1219_v21  ;;  %v1217_v23 = vld [vmem:[%s3750_s5 + $0x28] sm:$0xff]  ;;  %v1216_v24 = vld [vmem:[%s3750_s5 + $0x20] sm:$0xff]  ;;  %v1215_v25 = vld [vmem:[%s3750_s5 + $0x18] sm:$0xff]  ;;  %vm795_vm2 = vcmask 1046528  }
  0x31   : > { %s2158_s27 = sshll.u32 %s3852_s14, 8  ;;  %2254 = vmatpush3.msk.msra.mxu0 %vm513_vm0, %v444_v0  ;;  %s437_s29 = sadd.s32 8, %s2068_s21  ;;  %2286 = vmatpush3.msra.mxu1 %v1219_v21  ;;  %v1214_v26 = vld [vmem:[%s3750_s5 + $0x10] sm:$0xff]  ;;  %v1213_v27 = vld [vmem:[%s3750_s5 + $0x8] sm:$0xff]  ;;  %v1212_v28 = vld [vmem:[%s3750_s5] sm:$0xff]  ;;  %vm734_vm3 = vcmask 1040384  }
  0x32   : > { %s2753_s12 = scalar_lea.vmem %s3745_s0, %s2158_s27  ;;  %s3854_s22 = smov (!%p431_p3, %s2070_s22), 0  ;;  %2325 = vmatprep.subr.mxu0 %v1219_v21  ;;  %2287 = vmatprep.subr.mxu1 %v1218_v22  ;;  %v2826_v29 = vld [vmem:[%s3747_s2] ss:$0 sm:$0xff]  ;;  %v2839_v51 = vld [vmem:[#allocation2 + $0x1] ss:$0 sm:$0xff]  ;;  %vm1220_vm4 = vcmask 523264  }
  0x33   : > { %s2756_s18 = scalar_lea.vmem %s2753_s12, %s2159_s28  ;;  %s2071_s23 = sshll.u32 %s3854_s22, 4  ;;  %2288 = vmatpush3.msra.mxu1 %v1218_v22  ;;  %v2836_v48 = vld [vmem:[#allocation2] ss:$0 sm:$0xff]  ;;  %v2849_v60 = vld [vmem:[#allocation2 + $0x2] ss:$0 sm:$0xff]  ;;  %vm1925_vm5 = vcmask 392192  }
  0x34   : > { %s434_s26 = scalar_lea.vmem %s2753_s12, %s2071_s23  ;;  %v414_v3 = vld [vmem:[%s2756_s18] sm:$0xff]  ;;  %v415_v4 = vld [vmem:[%s2756_s18 + $0x8] sm:$0xff]  ;;  %v416_v5 = vld [vmem:[%s2756_s18 + $0x10] sm:$0xff]  ;;  %p438_p5 = scmp.lt.s32.totalorder %s437_s29, 15  ;;  %2289 = vmatprep.subr.mxu1 %v1217_v23 }
  0x35   : > { %v435_v1 = vld [vmem:[%s434_s26] sm:$0xff]  ;;  %v436_v2 = vld [vmem:[%s434_s26 + $0x8] sm:$0xff]  ;;  %v417_v6 = vld [vmem:[%s2756_s18 + $0x18] sm:$0xff]  ;;  %2290 = vmatpush3.msra.mxu1 %v1217_v23  ;;  %p702_p8 = scmp.gt.s32.totalorder %s2582_s13, 0  ;;  %p705_p13 = scmp.lt.s32.totalorder %s2582_s13, 1 }
  0x36   : > { %2255 = vmatprep.mubr.msk.f32.mxu0 %vm452_vm1, %v435_v1  ;;  %v418_v7 = vld [vmem:[%s2756_s18 + $0x20] sm:$0xff]  ;;  %v419_v8 = vld [vmem:[%s2756_s18 + $0x28] sm:$0xff]  ;;  %v420_v9 = vld [vmem:[%s2756_s18 + $0x30] sm:$0xff]  ;;  %s3856_s29 = smov (!%p438_p5, %s437_s29), 15  ;;  %2291 = vmatprep.subr.mxu1 %v1216_v24  ;;  %s2066_s30 = sshll.u32 %s3852_s14, 5 }
  0x37   : > { %2256 = vmatmul.mubr.msk.f32.vlgmr.msra.gmra.mxu0 %vm452_vm1, %v436_v2  ;;  %v421_v10 = vld [vmem:[%s2756_s18 + $0x38] sm:$0xff]  ;;  %v422_v11 = vld [vmem:[%s2756_s18 + $0x40] sm:$0xff]  ;;  %v423_v12 = vld [vmem:[%s2756_s18 + $0x48] sm:$0xff]  ;;  %s2072_s21 = sshll.u32 %s3856_s29, 4  ;;  %2292 = vmatpush3.msra.mxu1 %v1216_v24 }
  0x38   : > { %2258 = vmatprep.mubr.msk.f32.mxu0 %vm452_vm1, %v414_v3  ;;  %v424_v13 = vld [vmem:[%s2756_s18 + $0x50] sm:$0xff]  ;;  %v425_v14 = vld [vmem:[%s2756_s18 + $0x58] sm:$0xff]  ;;  %v426_v15 = vld [vmem:[%s2756_s18 + $0x60] sm:$0xff]  ;;  %s441_s24 = scalar_lea.vmem %s2753_s12, %s2072_s21  ;;  %2326 = vmatpush3.msra.mxu0 %v1219_v21 }
  0x39   : > { %v427_v16 = vld [vmem:[%s2756_s18 + $0x68] sm:$0xff]  ;;  %v428_v17 = vld [vmem:[%s2756_s18 + $0x70] sm:$0xff]  ;;  %v429_v18 = vld [vmem:[%s2756_s18 + $0x78] sm:$0xff]  ;;  %2327 = vmatprep.subr.mxu0 %v1218_v22  ;;  %2293 = vmatprep.subr.mxu1 %v1215_v25  ;;  %s703_s28 = scalar_select %p702_p8, 1, 0 }
  0x3a   : > { %v442_v19 = vld [vmem:[%s441_s24] sm:$0xff]  ;;  %v443_v20 = vld [vmem:[%s441_s24 + $0x8] sm:$0xff]  ;;  %2328 = vmatpush3.msra.mxu0 %v1218_v22  ;;  %2294 = vmatpush3.msra.mxu1 %v1215_v25  ;;  %s2832_s18 = scalar_select %p705_p13, 1, 0 }
  0x3b   : > { %2259 = vmatmul.mubr.msk.f32.gmra.mxu0 %vm452_vm1, %v415_v4  ;;  %2329 = vmatprep.subr.mxu0 %v1217_v23  ;;  %s704_s12 = scvt.s32.f32 %s703_s28  ;;  %s2065_s28 = sshll.u32 %s2582_s13, 4 }
  0x3c   : > { %2261 = vmatprep.mubr.msk.f32.mxu0 %vm452_vm1, %v416_v5  ;;  %2330 = vmatpush3.msra.mxu0 %v1217_v23  ;;  %s707_s23 = scvt.s32.f32 %s2832_s18  ;;  %v2860_v5 = vld [vmem:[#allocation2 + $0x4] ss:$0 sm:$0xff]  ;;  %p404_p0 = scmp.lt.s32.totalorder %s2065_s28, 31 }
  0x3d   : > { %2331 = vmatprep.subr.mxu0 %v1216_v24  ;;  %2295 = vmatprep.subr.mxu1 %v1214_v26  ;;  %v708_v32 = vstv %s704_s12 }
  0x3e   : > { %2332 = vmatpush3.msra.mxu0 %v1216_v24  ;;  %2296 = vmatpush3.msra.mxu1 %v1214_v26  ;;  %s3858_s28 = smov (!%p404_p0, %s2065_s28), 31 }
  0x3f   : > { %2262 = vmatmul.mubr.msk.f32.gmra.mxu0 %vm452_vm1, %v417_v6  ;;  %2333 = vmatprep.subr.mxu0 %v1215_v25  ;;  %s407_s11 = sadd.s32 %s2066_s30, %s3858_s28 }
  0x40   : > { %2264 = vmatprep.mubr.msk.f32.mxu0 %vm452_vm1, %v418_v7  ;;  %2334 = vmatpush3.msra.mxu0 %v1215_v25  ;;  %s2067_s12 = sshll.u32 %s407_s11, 3 }
  0x41   : > { %2335 = vmatprep.subr.mxu0 %v1214_v26  ;;  %2297 = vmatprep.subr.mxu1 %v1213_v27  ;;  %s3696_s21 = scalar_lea.vmem %s3755_s10, %s2067_s12 }
  0x42   : > { %2336 = vmatpush3.msra.mxu0 %v1214_v26  ;;  %2298 = vmatpush3.msra.mxu1 %v1213_v27 }
  0x43   : > { %2265 = vmatmul.mubr.msk.f32.gmra.mxu0 %vm452_vm1, %v419_v8  ;;  %2337 = vmatprep.subr.mxu0 %v1213_v27  ;;  %v2864_v8 = vstv %s707_s23 }
  0x44   : > { %2267 = vmatprep.mubr.msk.f32.mxu0 %vm452_vm1, %v420_v9  ;;  %2338 = vmatpush3.msra.mxu0 %v1213_v27 }
  0x45   : > { %2299 = vmatprep.subr.mxu1 %v1212_v28  ;;  %2339 = vmatprep.subr.mxu0 %v1212_v28 }
  0x46   : > { %2300 = vmatpush3.msra.mxu1 %v1212_v28  ;;  %2340 = vmatpush3.msra.mxu0 %v1212_v28 }
  0x47   : > { %2268 = vmatmul.mubr.msk.f32.gmra.mxu0 %vm452_vm1, %v421_v10 }
  0x48   : > { %2270 = vmatprep.mubr.msk.f32.mxu0 %vm452_vm1, %v422_v11 }
  0x4b   : > { %2271 = vmatmul.mubr.msk.f32.gmra.mxu0 %vm452_vm1, %v423_v12 }
  0x4c   : > { %2273 = vmatprep.mubr.msk.f32.mxu0 %vm452_vm1, %v424_v13  ;;  %v2870_v13 = vld [vmem:[#allocation2 + $0x5] ss:$0 sm:$0xff] }
  0x4f   : > { %2274 = vmatmul.mubr.msk.f32.gmra.mxu0 %vm452_vm1, %v425_v14 }
  0x50   : > { %2276 = vmatprep.mubr.msk.f32.mxu0 %vm452_vm1, %v426_v15 }
  0x53   : > { %2277 = vmatmul.mubr.msk.f32.gmra.mxu0 %vm452_vm1, %v427_v16 }
  0x54   : > { %2279 = vmatprep.mubr.msk.f32.mxu0 %vm452_vm1, %v428_v17  ;;  %v2874_v17 = vld [vmem:[#allocation2 + $0x3] ss:$0 sm:$0xff] }
  0x57   : > { %2280 = vmatmul.mubr.msk.f32.gmra.mxu0 %vm452_vm1, %v429_v18 }
  0x58   : > { %2282 = vmatprep.mubr.msk.f32.mxu0 %vm452_vm1, %v442_v19 }
  0x5b   : > { %2283 = vmatmul.mubr.msk.f32.gmra.mxu0 %vm452_vm1, %v443_v20 }
  0xf7   : > { %v2257_v30 = vpop.f32.mrf.mxu0 }
  0xf8   : > { %v589_v31 = vadd.f32 %v2257_v30, %v2826_v29 }
  0xf9   : > { %v583_v33 = vpop.f32.mrf.mxu0 }
  0xfa   : > { %v683_v34 = vmax.f32 %v589_v31, 0.0  ;;  %v584_v35 = vadd.f32 %v2826_v29, %v583_v33 }
  0xfb   : > { %v2260_v36 = vpop.f32.mrf.mxu0 }
  0xfc   : > { %v710_v37 = vmul.f32 %v708_v32, %v683_v34  ;;  %v682_v38 = vmax.f32 %v584_v35, 0.0  ;;  %v599_v39 = vadd.f32 %v2260_v36, %v2826_v29 }
  0xfd   : > { %v593_v40 = vpop.f32.mrf.mxu0 }
  0xfe   : > { %v709_v41 = vmul.f32 %v708_v32, %v682_v38  ;;  %v797_v42 = vrot.slane %v710_v37, 1  ;;  %v2834_v43 = vmax.f32 %v599_v39, 0.0  ;;  %v736_v45 = vrot.slane %v710_v37, 7 }
  0xff   : > { %v2263_v44 = vpop.f32.mrf.mxu0  ;;  %v594_v49 = vadd.f32 %v2826_v29, %v593_v40  ;;  %v899_v1 = vmul.f32 %v2839_v51, %v710_v37 }
 0x100   : > { %v735_v46 = vrot.slane %v709_v41, 7  ;;  %v796_v47 = vrot.slane %v709_v41, 1  ;;  %v800_v54 = vrot.slane %v2834_v43, 1  ;;  %v846_v55 = vsel %vm795_vm2, %v797_v42, 0.0 }
 0x101   : > { %v603_v50 = vpop.f32.mrf.mxu0  ;;  %v898_v58 = vmul.f32 %v2839_v51, %v709_v41  ;;  %v739_v62 = vrot.slane %v2834_v43, 7  ;;  %v2853_v63 = vmax.f32 %v594_v49, 0.0  ;;  %v609_v0 = vadd.f32 %v2263_v44, %v2826_v29 }
 0x102   : > { %v737_v52 = vsel %vm734_vm3, %v735_v46, %v736_v45  ;;  %v785_v53 = vsel %vm734_vm3, 0.0, %v735_v46  ;;  %v798_v61 = vsel %vm795_vm2, %v796_v47, %v797_v42  ;;  %v847_v4 = vsel %vm795_vm2, %v800_v54, 0.0 }
 0x103   : > { %v861_v56 = vmul.f32 %v2836_v48, %v785_v53  ;;  %v862_v57 = vmul.f32 %v2836_v48, %v737_v52  ;;  %v2266_v59 = vpop.f32.mrf.mxu0  ;;  %v738_v6 = vrot.slane %v2853_v63, 7  ;;  %v604_v7 = vadd.f32 %v2826_v29, %v603_v50 }
 0x104   : > { %v936_v9 = vmul.f32 %v2849_v60, %v846_v55  ;;  %v935_v11 = vmul.f32 %v2849_v60, %v798_v61  ;;  %v901_v12 = vmul.f32 %v2839_v51, %v2834_v43  ;;  %v2876_v18 = vmax.f32 %v609_v0, 0.0 }
 0x105   : > { %v914_v2 = vadd.f32 %v898_v58, %v861_v56  ;;  %v613_v3 = vpop.f32.mrf.mxu0  ;;  %v915_v10 = vadd.f32 %v899_v1, %v862_v57  ;;  %v740_v15 = vsel %vm734_vm3, %v738_v6, %v739_v62  ;;  %v786_v16 = vsel %vm734_vm3, 0.0, %v738_v6 }
 0x106   : > { %v619_v19 = vadd.f32 %v2266_v59, %v2826_v29  ;;  %v938_v21 = vmul.f32 %v2849_v60, %v847_v4  ;;  %v2882_v22 = vmul.f32 %v2860_v5, %v2834_v43  ;;  %v864_v23 = vmul.f32 %v2836_v48, %v740_v15 }
 0x107   : > { %v2269_v14 = vpop.f32.mrf.mxu0  ;;  %v951_v20 = vadd.f32 %v935_v11, %v914_v2  ;;  %v2886_v25 = vmul.f32 %v2870_v13, %v847_v4  ;;  %v799_v26 = vrot.slane %v2853_v63, 1  ;;  %v2889_v27 = vmax.f32 %v604_v7, 0.0 }
 0x108   : > { %v614_v28 = vadd.f32 %v2826_v29, %v613_v3  ;;  %v952_v30 = vadd.f32 %v936_v9, %v915_v10  ;;  %v863_v31 = vmul.f32 %v2836_v48, %v786_v16  ;;  %v900_v32 = vmul.f32 %v2839_v51, %v2853_v63 }
 0x109   : > { %v623_v24 = vpop.f32.mrf.mxu0  ;;  %v972_v33 = vmul.f32 %v2874_v17, %v786_v16  ;;  %v973_v35 = vmul.f32 %v2874_v17, %v740_v15  ;;  %v1009_v36 = vmul.f32 %v2860_v5, %v2853_v63  ;;  %v2900_v38 = vmax.f32 %v619_v19, 0.0 }
 0x10a   : > { %v917_v39 = vadd.f32 %v901_v12, %v864_v23  ;;  %v2904_v41 = vmul.f32 %v2839_v51, %v2876_v18  ;;  %v2908_v42 = vmul.f32 %v2860_v5, %v2876_v18  ;;  %v3760_v45 = vrot.slane %v2889_v27, 7 }
 0x10b   : > { %v2272_v34 = vpop.f32.mrf.mxu0  ;;  %v988_v40 = vadd.f32 %v972_v33, %v951_v20  ;;  %v2911_v46 = vmax.f32 %v614_v28, 0.0  ;;  %v629_v47 = vadd.f32 %v2269_v14, %v2826_v29  ;;  %v624_v49 = vadd.f32 %v2826_v29, %v623_v24 }
 0x10c   : > { %v2915_v50 = vadd.f32 %v900_v32, %v863_v31  ;;  %v2917_v52 = vadd.f32 %v973_v35, %v952_v30  ;;  %v2921_v53 = vmul.f32 %v2839_v51, %v2889_v27  ;;  %v2926_v57 = vmul.f32 %v2860_v5, %v2889_v27 }
 0x10d   : > { %v633_v44 = vpop.f32.mrf.mxu0  ;;  %v3758_v61 = vrot.slane %v2911_v46, 7  ;;  %v2931_v62 = vadd.f32 %v938_v21, %v917_v39  ;;  %v2933_v63 = vadd.f32 %v1009_v36, %v988_v40  ;;  %v2935_v0 = vmax.f32 %v624_v49, 0.0 }
 0x10e   : > { %v634_v55 = vadd.f32 %v2826_v29, %v633_v44  ;;  %v639_v1 = vadd.f32 %v2272_v34, %v2826_v29  ;;  %v2940_v3 = vmul.f32 %v2839_v51, %v2900_v38  ;;  %v2947_v6 = vmax.f32 %v629_v47, 0.0 }
 0x10f   : > { %v2275_v56 = vpop.f32.mrf.mxu0  ;;  %v2945_v4 = vsel %vm734_vm3, 0.0, %v3758_v61  ;;  %v2953_v9 = vmul.f32 %v2860_v5, %v2900_v38  ;;  %v2958_v11 = vsel %vm734_vm3, 0.0, %v3760_v45  ;;  %v2963_v12 = vsel %vm795_vm2, %v799_v26, %v800_v54 }
 0x110   : > { %v2949_v7 = vmax.f32 %v634_v55, 0.0  ;;  %v802_v14 = vrot.slane %v2889_v27, 1  ;;  %v867_v15 = vmul.f32 %v2836_v48, %v2945_v4  ;;  %v3757_v16 = vrot.slane %v2935_v0, 7 }
 0x111   : > { %v643_v2 = vpop.f32.mrf.mxu0  ;;  %v649_v19 = vadd.f32 %v2275_v56, %v2826_v29  ;;  %v904_v23 = vmul.f32 %v2839_v51, %v2911_v46  ;;  %v2976_v43 = vmul.f32 %v2860_v5, %v2911_v46  ;;  %v2978_v54 = vmax.f32 %v639_v1, 0.0 }
 0x112   : > { %v644_v20 = vadd.f32 %v2826_v29, %v643_v2  ;;  %v2984_v26 = vsel %vm734_vm3, 0.0, %v3757_v16  ;;  %v3756_v28 = vrot.slane %v2949_v7, 7  ;;  %v2991_v32 = vmul.f32 %v2839_v51, %v2947_v6 }
 0x113   : > { %v2278_v10 = vpop.f32.mrf.mxu0  ;;  %v2995_v33 = vmul.f32 %v2860_v5, %v2947_v6  ;;  %v2998_v36 = vadd.f32 %v904_v23, %v867_v15  ;;  %v906_v39 = vmul.f32 %v2839_v51, %v2935_v0  ;;  %v3002_v40 = vmax.f32 %v649_v19, 0.0 }
 0x114   : > { %v3004_v44 = vmax.f32 %v644_v20, 0.0  ;;  %v869_v47 = vmul.f32 %v2836_v48, %v2984_v26  ;;  %v3010_v49 = vmul.f32 %v2860_v5, %v2935_v0  ;;  %v3016_v56 = vsel %vm734_vm3, 0.0, %v3756_v28 }
 0x115   : > { %3775 = vst [vmem:[#allocation8_spill] sm:$0xff] %v2995_v33  ;;  %v653_v35 = vpop.f32.mrf.mxu0  ;;  %3776 = vst [vmem:[#allocation9_spill] sm:$0xff] %v3002_v40  ;;  %v3020_v1 = vmul.f32 %v2874_v17, %v2984_v26  ;;  %v3025_v15 = vmul.f32 %v2839_v51, %v2978_v54  ;;  %v3029_v19 = vmul.f32 %v2860_v5, %v2978_v54  ;;  %v3761_v20 = vrot.slane %v3002_v40, 1 }
 0x116   : > { %3777 = vst [vmem:[#allocation10_spill] sm:$0xff] %v3004_v44  ;;  %v3759_v23 = vrot.slane %v3004_v44, 7  ;;  %v814_v28 = vrot.slane %v3004_v44, 1  ;;  %v659_v55 = vadd.f32 %v2278_v10, %v2826_v29  ;;  %v871_v2 = vmul.f32 %v2836_v48, %v3016_v56 }
 0x117   : > { %3778 = vst [vmem:[#allocation11_spill] sm:$0xff] %v3025_v15  ;;  %3779 = vst [vmem:[#allocation12_spill] sm:$0xff] %v3029_v19  ;;  %v2281_v16 = vpop.f32.mrf.mxu0  ;;  %v654_v34 = vadd.f32 %v2826_v29, %v653_v35  ;;  %v3040_v61 = vadd.f32 %v906_v39, %v869_v47  ;;  %v908_v58 = vmul.f32 %v2839_v51, %v2949_v7 }
 0x118   : > { %v669_v31 = vadd.f32 %v2281_v16, %v2826_v29  ;;  %v3046_v21 = vmul.f32 %v2860_v5, %v2949_v7  ;;  %v3051_v10 = vsel %vm734_vm3, 0.0, %v3759_v23  ;;  %v3055_v24 = vmul.f32 %v2874_v17, %v3016_v56 }
 0x119   : > { %3781 = vst [vmem:[#allocation14_spill] sm:$0xff] %v3051_v10  ;;  %v873_v35 = vmul.f32 %v2836_v48, %v3051_v10  ;;  %v865_v39 = vmul.f32 %v2836_v48, %v2958_v11  ;;  %v3065_v47 = vsel %vm795_vm2, %v814_v28, %v3761_v20  ;;  %v910_v23 = vmul.f32 %v2839_v51, %v3004_v44 }
 0x11a   : > { %3780 = vst [vmem:[#allocation13_spill] sm:$0xff] %v3046_v21  ;;  %3782 = vst [vmem:[#allocation15_spill] sm:$0xff] %v3055_v24  ;;  %v3069_v59 = vmax.f32 %v659_v55, 0.0  ;;  %v3071_v45 = vmax.f32 %v654_v34, 0.0  ;;  %v3073_v37 = vadd.f32 %v908_v58, %v871_v2  ;;  %v3077_v16 = vmul.f32 %v2839_v51, %v3002_v40 }
 0x11b   : > { %3783 = vst [vmem:[#allocation16_spill] sm:$0xff] %v3065_v47  ;;  %v3081_v30 = vmul.f32 %v2860_v5, %v3002_v40  ;;  %v3083_v19 = vmax.f32 %v669_v31, 0.0  ;;  %v926_v28 = vadd.f32 %v910_v23, %v873_v35  ;;  %v3087_v20 = vmul.f32 %v2860_v5, %v3004_v44  ;;  %v3140_v44 = vld [vmem:[#allocation2 + $0x7] ss:$0 sm:$0xff] }
 0x11c   : > { %3784 = vst [vmem:[#allocation17_spill] sm:$0xff] %v3071_v45  ;;  %3785 = vst [vmem:[#allocation18_spill] sm:$0xff] %v3077_v16  ;;  %v3788_v58 = vrot.slane %v2876_v18, 1  ;;  %v947_v2 = vmul.f32 %v2849_v60, %v3065_v47  ;;  %v3097_v16 = vmul.f32 %v2874_v17, %v3051_v10  ;;  %v918_v31 = vadd.f32 %v2921_v53, %v865_v39  ;;  %v3125_v47 = vld [vmem:[#allocation2 + $0x6] ss:$0 sm:$0xff] }
 0x11d   : > { %3786 = vst [vmem:[#allocation19_spill] sm:$0xff] %v3081_v30  ;;  %3787 = vst [vmem:[#allocation20_spill] sm:$0xff] %v3087_v20  ;;  %v937_v23 = vmul.f32 %v2849_v60, %v2963_v12  ;;  %v3106_v30 = vmul.f32 %v2839_v51, %v3069_v59  ;;  %v3115_v20 = vmul.f32 %v2860_v5, %v3069_v59 }
 0x11e   : > { %v804_v55 = vsel %vm795_vm2, %v802_v14, %v3788_v58  ;;  %3789 = vst [vmem:[#allocation21_spill] sm:$0xff] %v3097_v16  ;;  %v3791_v14 = vrot.slane %v3071_v45, 7  ;;  %v963_v34 = vadd.f32 %v947_v2, %v926_v28  ;;  %v817_v16 = vrot.slane %v3071_v45, 1 }
 0x11f   : > { %3790 = vst [vmem:[#allocation22_spill] sm:$0xff] %v3106_v30  ;;  %3792 = vst [vmem:[#allocation23_spill] sm:$0xff] %v3115_v20  ;;  %v939_v39 = vmul.f32 %v2849_v60, %v804_v55  ;;  %v953_v35 = vadd.f32 %v937_v23, %v2915_v50  ;;  %v912_v20 = vmul.f32 %v2839_v51, %v3071_v45  ;;  %v3794_v51 = vrot.slane %v3083_v19, 1 }
 0x120   : > { %v3111_v58 = vsel %vm734_vm3, 0.0, %v3791_v14  ;;  %v974_v14 = vmul.f32 %v2874_v17, %v2958_v11  ;;  %v976_v53 = vmul.f32 %v2874_v17, %v2945_v4  ;;  %v1046_v50 = vmul.f32 %v2870_v13, %v2963_v12 }
 0x121   : > { %v984_v30 = vmul.f32 %v2874_v17, %v3111_v58  ;;  %v955_v10 = vadd.f32 %v939_v39, %v918_v31  ;;  %v1021_v28 = vmul.f32 %v2860_v5, %v3071_v45  ;;  %v3138_v23 = vmul.f32 %v2860_v5, %v3083_v19  ;;  %v3150_v45 = vld [vmem:[#allocation2 + $0x8] ss:$0 sm:$0xff] }
 0x122   : > { %v990_v40 = vadd.f32 %v974_v14, %v953_v35  ;;  %v3145_v31 = vsel %vm795_vm2, %v3794_v51, 0.0  ;;  %v1062_v12 = vadd.f32 %v1046_v50, %v2933_v63  ;;  %v1083_v39 = vmul.f32 %v3125_v47, %v2958_v11 }
 0x123   : > { %3793 = vst [vmem:[#allocation24_spill] sm:$0xff] %v3138_v23  ;;  %3795 = vst [vmem:[#allocation25_spill] sm:$0xff] %v3145_v31  ;;  %v3796_v2 = vrot.slane %v2876_v18, 7  ;;  %v3797_v23 = vrot.slane %v2889_v27, 7  ;;  %v3798_v35 = vrot.slane %v3069_v59, 1  ;;  %v875_v51 = vmul.f32 %v2836_v48, %v3111_v58 }
 0x124   : > { %v1000_v63 = vadd.f32 %v984_v30, %v963_v34  ;;  %v1027_v50 = vadd.f32 %v2926_v57, %v990_v40  ;;  %v992_v11 = vadd.f32 %v976_v53, %v955_v10  ;;  %v1099_v15 = vadd.f32 %v1083_v39, %v1062_v12  ;;  %v3181_v12 = vld [vmem:[#allocation4] ss:$0 sm:$0xff] }
 0x125   : > { %v743_v21 = vsel %vm734_vm3, %v3797_v23, %v3796_v2  ;;  %v3160_v14 = vsel %vm795_vm2, %v817_v16, %v3798_v35  ;;  %v1120_v24 = vmul.f32 %v3140_v44, %v2889_v27  ;;  %v1026_v33 = vadd.f32 %v2882_v22, %v2917_v52  ;;  %v663_v2 = vpop.f32.mrf.mxu0 }
 0x126   : > { %v3171_v23 = vmul.f32 %v2870_v13, %v3145_v31  ;;  %v1048_v16 = vmul.f32 %v2870_v13, %v804_v55  ;;  %v1157_v35 = vmul.f32 %v3150_v45, %v804_v55  ;;  %v866_v30 = vmul.f32 %v2836_v48, %v743_v21 }
 0x127   : > { %v1136_v57 = vadd.f32 %v1120_v24, %v1099_v15  ;;  %v3799_v40 = vrot.slane %v2876_v18, 1  ;;  %v1063_v27 = vadd.f32 %v2886_v25, %v1026_v33  ;;  %v1084_v22 = vmul.f32 %v3125_v47, %v743_v21 }
 0x128   : > { %v928_v52 = vadd.f32 %v912_v20, %v875_v51  ;;  %v1037_v34 = vadd.f32 %v1021_v28, %v1000_v63  ;;  %v1064_v53 = vadd.f32 %v1048_v16, %v1027_v50  ;;  %v664_v39 = vadd.f32 %v2826_v29, %v663_v2 }
 0x129   : > { %v848_v10 = vsel %vm795_vm2, %v3799_v40, 0.0  ;;  %v3185_v55 = vadd.f32 %v2976_v43, %v992_v11  ;;  %v1173_v31 = vadd.f32 %v1157_v35, %v1136_v57  ;;  %v1100_v24 = vadd.f32 %v1084_v22, %v1063_v27  ;;  %v2284_v57 = vpop.f32.mrf.mxu0 }
 0x12a   : > { %v1121_v15 = vmul.f32 %v3140_v44, %v2876_v18  ;;  %v919_v40 = vadd.f32 %v2904_v41, %v866_v30  ;;  %v940_v25 = vmul.f32 %v2849_v60, %v848_v10  ;;  %v698_v33 = vmax.f32 %v664_v39, 0.0 }
 0x12b   : > { %v1085_v20 = vmul.f32 %v3125_v47, %v2945_v4  ;;  %v3194_v28 = vadd.f32 %v3181_v12, %v1173_v31  ;;  %v1158_v43 = vmul.f32 %v3150_v45, %v848_v10  ;;  %v949_v63 = vmul.f32 %v2849_v60, %v3160_v14 }
 0x12c   : > { %v1137_v51 = vadd.f32 %v1121_v15, %v1100_v24  ;;  %v975_v50 = vmul.f32 %v2874_v17, %v743_v21  ;;  %v1049_v18 = vmul.f32 %v2870_v13, %v848_v10  ;;  %v759_v41 = vrot.slane %v698_v33, 7 }
 0x12d   : > { %v1101_v11 = vadd.f32 %v1085_v20, %v1064_v53  ;;  %2301 = vmatprep.mubr.msk.f32.mxu1 %vm1220_vm4, %v3194_v28  ;;  %v965_v4 = vadd.f32 %v949_v63, %v928_v52  ;;  %v1058_v31 = vmul.f32 %v2870_v13, %v3160_v14  ;;  %v3800_v16 = vrot.slane %v2900_v38, 1 }
 0x12e   : > { %v1174_v2 = vadd.f32 %v1158_v43, %v1137_v51  ;;  %v3801_v35 = vrot.slane %v2911_v46, 1  ;;  %v793_v21 = vsel %vm734_vm3, 0.0, %v759_v41  ;;  %v820_v10 = vrot.slane %v698_v33, 1 }
 0x12f   : > { %v1122_v27 = vmul.f32 %v3140_v44, %v2911_v46  ;;  %v679_v22 = vadd.f32 %v2284_v57, %v2826_v29  ;;  %v3214_v53 = vadd.f32 %v940_v25, %v919_v40  ;;  %v986_v39 = vmul.f32 %v2874_v17, %v793_v21 }
 0x130   : > { %v807_v30 = vsel %vm795_vm2, %v3801_v35, %v3800_v16  ;;  %v3217_v52 = vadd.f32 %v3181_v12, %v1174_v2  ;;  %v1074_v24 = vadd.f32 %v1058_v31, %v1037_v34  ;;  %v3802_v63 = vrot.slane %v3083_v19, 7 }
 0x131   : > { %v941_v15 = vmul.f32 %v2849_v60, %v807_v30  ;;  %v1138_v20 = vadd.f32 %v1122_v27, %v1101_v11  ;;  %v1159_v51 = vmul.f32 %v3150_v45, %v807_v30  ;;  %v701_v43 = vmax.f32 %v679_v22, 0.0 }
 0x132   : > { %2302 = vmatmul.mubr.msk.f32.vlgmr.msra.gmra.mxu1 %vm1220_vm4, %v3217_v52  ;;  %v761_v40 = vsel %vm734_vm3, %v759_v41, %v3802_v63  ;;  %v1095_v25 = vmul.f32 %v3125_v47, %v793_v21  ;;  %v1050_v2 = vmul.f32 %v2870_v13, %v807_v30  ;;  %v991_v16 = vadd.f32 %v975_v50, %v2931_v62 }
 0x133   : > { %v3803_v34 = vrot.slane %v3083_v19, 1  ;;  %v1002_v31 = vadd.f32 %v986_v39, %v965_v4  ;;  %v1175_v35 = vadd.f32 %v1159_v51, %v1138_v20  ;;  %v3804_v57 = vrot.slane %v2900_v38, 7  ;;  %v673_v20 = vpop.f32.mrf.mxu0 }
 0x134   : > { %v3805_v27 = vrot.slane %v2911_v46, 7  ;;  %v1111_v41 = vadd.f32 %v1095_v25, %v1074_v24  ;;  %v3241_v21 = vmul.f32 %v2864_v8, %v701_v43  ;;  %v3806_v30 = vrot.slane %v2900_v38, 1 }
 0x135   : > { %v3233_v11 = vsel %vm795_vm2, %v820_v10, %v3803_v34  ;;  %v1028_v50 = vadd.f32 %v2908_v42, %v991_v16  ;;  %v1023_v10 = vmul.f32 %v2860_v5, %v698_v33  ;;  %v1132_v4 = vmul.f32 %v3140_v44, %v698_v33 }
 0x136   : > { %v746_v22 = vsel %vm734_vm3, %v3805_v27, %v3804_v57  ;;  %v849_v62 = vsel %vm795_vm2, %v3806_v30, 0.0  ;;  %v957_v39 = vadd.f32 %v941_v15, %v2998_v36  ;;  %v3251_v46 = vadd.f32 %v3181_v12, %v1175_v35 }
 0x137   : > { %v3254_v24 = vmul.f32 %v2874_v17, %v761_v40  ;;  %v1060_v51 = vmul.f32 %v2870_v13, %v3233_v11  ;;  %v3259_v43 = vmul.f32 %v3125_v47, %v761_v40  ;;  %v868_v42 = vmul.f32 %v2836_v48, %v746_v22 }
 0x138   : > { %v1039_v5 = vadd.f32 %v1023_v10, %v1002_v31  ;;  %2304 = vmatprep.mubr.msk.f32.mxu1 %vm1220_vm4, %v3251_v46  ;;  %v942_v36 = vmul.f32 %v2849_v60, %v849_v62  ;;  %v1065_v33 = vadd.f32 %v1049_v18, %v1028_v50  ;;  %v1086_v15 = vmul.f32 %v3125_v47, %v746_v22 }
 0x139   : > { %v3266_v63 = vadd.f32 %v1132_v4, %v1111_v41  ;;  %v763_v25 = vrot.slane %v3241_v21, 7  ;;  %v977_v16 = vmul.f32 %v2874_v17, %v746_v22  ;;  %v674_v40 = vadd.f32 %v2826_v29, %v673_v20 }
 0x13a   : > { %v1102_v34 = vadd.f32 %v1086_v15, %v1065_v33  ;;  %v1123_v31 = vmul.f32 %v3140_v44, %v2900_v38  ;;  %v1066_v35 = vadd.f32 %v1050_v2, %v3185_v55  ;;  %v1087_v57 = vmul.f32 %v3125_v47, %v2984_v26 }
 0x13b   : > { %v921_v18 = vadd.f32 %v2940_v3, %v868_v42  ;;  %v1160_v27 = vmul.f32 %v3150_v45, %v849_v62  ;;  %v700_v41 = vmax.f32 %v674_v40, 0.0  ;;  %v3807_v30 = vrot.slane %v2947_v6, 1 }
 0x13c   : > { %v3808_v22 = vrot.slane %v2935_v0, 1  ;;  %v1139_v50 = vadd.f32 %v1123_v31, %v1102_v34  ;;  %v1103_v10 = vadd.f32 %v1087_v57, %v1066_v35  ;;  %v1124_v38 = vmul.f32 %v3140_v44, %v2935_v0 }
 0x13d   : > { %v3809_v55 = vrot.slane %v2947_v6, 7  ;;  %v3810_v26 = vrot.slane %v2935_v0, 7  ;;  %v1076_v2 = vadd.f32 %v1060_v51, %v1039_v5  ;;  %v824_v4 = vrot.slane %v3241_v21, 1 }
 0x13e   : > { %v810_v29 = vsel %vm795_vm2, %v3808_v22, %v3807_v30  ;;  %v712_v20 = vmul.f32 %v2864_v8, %v700_v41  ;;  %v1051_v33 = vmul.f32 %v2870_v13, %v849_v62  ;;  %v1176_v15 = vadd.f32 %v1160_v27, %v1139_v50 }
 0x13f   : > { %v749_v3 = vsel %vm734_vm3, %v3810_v26, %v3809_v55  ;;  %v1140_v40 = vadd.f32 %v1124_v38, %v1103_v10  ;;  %v1161_v34 = vmul.f32 %v3150_v45, %v810_v29  ;;  %v958_v31 = vadd.f32 %v942_v36, %v921_v18 }
 0x140   : > { %v870_v42 = vmul.f32 %v2836_v48, %v749_v3  ;;  %v762_v35 = vrot.slane %v712_v20, 7  ;;  %v943_v57 = vmul.f32 %v2849_v60, %v810_v29  ;;  %v3811_v0 = vmov %v3807_v30 }
 0x141   : > { %v850_v51 = vsel %vm795_vm2, %v3811_v0, 0.0  ;;  %v3300_v5 = vadd.f32 %v3181_v12, %v1176_v15  ;;  %v1052_v8 = vmul.f32 %v2870_v13, %v810_v29  ;;  %v1177_v41 = vadd.f32 %v1161_v34, %v1140_v40 }
 0x142   : > { %v993_v62 = vadd.f32 %v977_v16, %v3214_v53  ;;  %v794_v27 = vsel %vm734_vm3, 0.0, %v762_v35  ;;  %v823_v30 = vrot.slane %v712_v20, 1  ;;  %v959_v36 = vadd.f32 %v943_v57, %v3040_v61 }
 0x143   : > { %v923_v18 = vadd.f32 %v2991_v32, %v870_v42  ;;  %2305 = vmatmul.mubr.msk.f32.gmra.mxu1 %vm1220_vm4, %v3300_v5  ;;  %v1097_v22 = vmul.f32 %v3125_v47, %v794_v27  ;;  %v3311_v50 = vadd.f32 %v3181_v12, %v1177_v41  ;;  %v944_v29 = vmul.f32 %v2849_v60, %v850_v51 }
 0x144   : > { %v1030_v10 = vadd.f32 %v2953_v9, %v993_v62  ;;  %v3316_v53 = vmul.f32 %v3140_v44, %v712_v20  ;;  %v979_v16 = vmul.f32 %v2874_v17, %v749_v3  ;;  %v1053_v61 = vmul.f32 %v2870_v13, %v850_v51 }
 0x145   : > { %v3812_v32 = vrot.slane %v2978_v54, 1  ;;  %v3813_v38 = vrot.slane %v2949_v7, 1  ;;  %v3326_v26 = vsel %vm734_vm3, %v762_v35, %v763_v25  ;;  %2307 = vmatprep.mubr.msk.f32.mxu1 %vm1220_vm4, %v3311_v50  ;;  %v1088_v20 = vmul.f32 %v3125_v47, %v749_v3 }
 0x146   : > { %v1067_v9 = vadd.f32 %v1051_v33, %v1030_v10  ;;  %v994_v42 = vadd.f32 %v3020_v1, %v957_v39  ;;  %v3335_v15 = vsel %vm795_vm2, %v823_v30, %v824_v4  ;;  %v960_v40 = vadd.f32 %v944_v29, %v923_v18  ;;  %v3817_v10 = vld [vmem:[#allocation8_spill] sm:$0xff] }
 0x147   : > { %v813_v55 = vsel %vm795_vm2, %v3813_v38, %v3812_v32  ;;  %v1125_v34 = vmul.f32 %v3140_v44, %v2947_v6  ;;  %v1162_v25 = vmul.f32 %v3150_v45, %v850_v51  ;;  %v3340_v35 = vadd.f32 %v1097_v22, %v1076_v2 }
 0x148   : > { %v1104_v57 = vadd.f32 %v1088_v20, %v1067_v9  ;;  %v945_v33 = vmul.f32 %v2849_v60, %v813_v55  ;;  %v1031_v3 = vadd.f32 %v3010_v49, %v994_v42  ;;  %v1054_v1 = vmul.f32 %v2870_v13, %v813_v55 }
 0x149   : > { %v3814_v39 = vrot.slane %v2978_v54, 7  ;;  %v3815_v0 = vrot.slane %v2949_v7, 7  ;;  %v3816_v62 = vmov %v3812_v32  ;;  %v995_v51 = vadd.f32 %v979_v16, %v958_v31 }
 0x14a   : > { %v851_v6 = vsel %vm795_vm2, %v3816_v62, 0.0  ;;  %v1141_v2 = vadd.f32 %v1125_v34, %v1104_v57  ;;  %v1068_v27 = vadd.f32 %v1052_v8, %v1031_v3  ;;  %v1089_v30 = vmul.f32 %v3125_v47, %v3016_v56  ;;  %v3819_v34 = vld [vmem:[#allocation11_spill] sm:$0xff]  ;;  %v3820_v3 = vld [vmem:[#allocation13_spill] sm:$0xff]  ;;  %v3823_v62 = vld [vmem:[#allocation10_spill] sm:$0xff] }
 0x14b   : > { %v752_v41 = vsel %vm734_vm3, %v3815_v0, %v3814_v39  ;;  %v961_v18 = vadd.f32 %v945_v33, %v3073_v37  ;;  %v1126_v22 = vmul.f32 %v3140_v44, %v2949_v7  ;;  %v1163_v29 = vmul.f32 %v3150_v45, %v813_v55  ;;  %v3818_v37 = vld [vmem:[#allocation15_spill] sm:$0xff]  ;;  %v3821_v0 = vld [vmem:[#allocation9_spill] sm:$0xff] }
 0x14c   : > { %v872_v49 = vmul.f32 %v2836_v48, %v752_v41  ;;  %v1032_v32 = vadd.f32 %v3817_v10, %v995_v51  ;;  %v1178_v38 = vadd.f32 %v1162_v25, %v1141_v2  ;;  %v1105_v9 = vadd.f32 %v1089_v30, %v1068_v27  ;;  %v3826_v30 = vld [vmem:[#allocation14_spill] sm:$0xff] }
 0x14d   : > { %v946_v31 = vmul.f32 %v2849_v60, %v851_v6  ;;  %v1127_v8 = vmul.f32 %v3140_v44, %v2978_v54  ;;  %v981_v56 = vmul.f32 %v2874_v17, %v752_v41  ;;  %v1090_v20 = vmul.f32 %v3125_v47, %v752_v41 }
 0x14e   : > { %v1069_v16 = vadd.f32 %v1053_v61, %v1032_v32  ;;  %v996_v42 = vadd.f32 %v3818_v37, %v959_v36  ;;  %v3368_v7 = vadd.f32 %v3181_v12, %v1178_v38  ;;  %v1142_v55 = vadd.f32 %v1126_v22, %v1105_v9  ;;  %v3827_v37 = vld [vmem:[#allocation16_spill] sm:$0xff] }
 0x14f   : > { %v925_v57 = vadd.f32 %v3819_v34, %v872_v49  ;;  %v1055_v25 = vmul.f32 %v2870_v13, %v851_v6  ;;  %v3822_v54 = vrot.slane %v3821_v0, 7  ;;  %v3824_v51 = vrot.slane %v3823_v62, 7  ;;  %v3828_v34 = vld [vmem:[#allocation18_spill] sm:$0xff] }
 0x150   : > { %v1106_v33 = vadd.f32 %v1090_v20, %v1069_v16  ;;  %v1033_v39 = vadd.f32 %v3820_v3, %v996_v42  ;;  %v3825_v41 = vrot.slane %v3821_v0, 1  ;;  %2308 = vmatmul.mubr.msk.f32.gmra.mxu1 %vm1220_vm4, %v3368_v7  ;;  %v1179_v2 = vadd.f32 %v1163_v29, %v1142_v55 }
 0x151   : > { %v755_v61 = vsel %vm734_vm3, %v3824_v51, %v3822_v54  ;;  %v1164_v27 = vmul.f32 %v3150_v45, %v851_v6  ;;  %v1091_v49 = vmul.f32 %v3125_v47, %v3826_v30  ;;  %v1128_v38 = vmul.f32 %v3140_v44, %v3823_v62  ;;  %v3829_v54 = vld [vmem:[#allocation12_spill] sm:$0xff] }
 0x152   : > { %v852_v36 = vsel %vm795_vm2, %v3825_v41, 0.0  ;;  %v874_v22 = vmul.f32 %v2836_v48, %v755_v61  ;;  %v1143_v10 = vadd.f32 %v1127_v8, %v1106_v33  ;;  %v1070_v32 = vadd.f32 %v1054_v1, %v1033_v39  ;;  %v3831_v41 = vld [vmem:[#allocation20_spill] sm:$0xff] }
 0x153   : > { %v997_v9 = vadd.f32 %v981_v56, %v960_v40  ;;  %v3390_v16 = vadd.f32 %v3181_v12, %v1179_v2  ;;  %v962_v20 = vadd.f32 %v946_v31, %v925_v57  ;;  %v1165_v29 = vmul.f32 %v3150_v45, %v3827_v37  ;;  %v3830_v56 = vld [vmem:[#allocation21_spill] sm:$0xff] }
 0x154   : > { %v948_v6 = vmul.f32 %v2849_v60, %v852_v36  ;;  %v1180_v42 = vadd.f32 %v1164_v27, %v1143_v10  ;;  %v1107_v55 = vadd.f32 %v1091_v49, %v1070_v32  ;;  %v927_v3 = vadd.f32 %v3828_v34, %v874_v22 }
 0x155   : > { %v1034_v8 = vadd.f32 %v3829_v54, %v997_v9  ;;  %2310 = vmatprep.mubr.msk.f32.mxu1 %vm1220_vm4, %v3390_v16  ;;  %v983_v40 = vmul.f32 %v2874_v17, %v755_v61  ;;  %v1092_v1 = vmul.f32 %v3125_v47, %v755_v61  ;;  %v1129_v31 = vmul.f32 %v3140_v44, %v3821_v0  ;;  %v3833_v61 = vld [vmem:[#allocation17_spill] sm:$0xff] }
 0x156   : > { %v998_v57 = vadd.f32 %v3830_v56, %v961_v18  ;;  %v3405_v33 = vadd.f32 %v3181_v12, %v1180_v42  ;;  %v1144_v39 = vadd.f32 %v1128_v38, %v1107_v55  ;;  %v1166_v51 = vmul.f32 %v3150_v45, %v852_v36 }
 0x157   : > { %v1071_v62 = vadd.f32 %v1055_v25, %v1034_v8  ;;  %v1056_v27 = vmul.f32 %v2870_v13, %v3827_v37  ;;  %v3832_v30 = vrot.slane %v3069_v59, 7  ;;  %v3834_v49 = vrot.slane %v3833_v61, 7  ;;  %v3836_v8 = vld [vmem:[#allocation22_spill] sm:$0xff] }
 0x158   : > { %v1035_v2 = vadd.f32 %v3831_v41, %v998_v57  ;;  %v3835_v18 = vrot.slane %v3069_v59, 1  ;;  %2311 = vmatmul.mubr.msk.f32.gmra.mxu1 %vm1220_vm4, %v3405_v33  ;;  %v1181_v25 = vadd.f32 %v1165_v29, %v1144_v39  ;;  %v964_v10 = vadd.f32 %v948_v6, %v927_v3  ;;  %v3837_v3 = vld [vmem:[#allocation19_spill] sm:$0xff] }
 0x159   : > { %v758_v0 = vsel %vm734_vm3, %v3834_v49, %v3832_v30  ;;  %v1108_v32 = vadd.f32 %v1092_v1, %v1071_v62  ;;  %v1093_v37 = vmul.f32 %v3125_v47, %v3111_v58  ;;  %v999_v55 = vadd.f32 %v983_v40, %v962_v20 }
 0x15a   : > { %v853_v22 = vsel %vm795_vm2, %v3835_v18, 0.0  ;;  %v876_v38 = vmul.f32 %v2836_v48, %v758_v0  ;;  %v1072_v9 = vadd.f32 %v1056_v27, %v1035_v2  ;;  %v985_v42 = vmul.f32 %v2874_v17, %v758_v0  ;;  %v3838_v2 = vld [vmem:[#allocation23_spill] sm:$0xff]  ;;  %v3839_v18 = vld [vmem:[#allocation24_spill] sm:$0xff] }
 0x15b   : > { %v3426_v34 = vadd.f32 %v3181_v12, %v1181_v25  ;;  %v1145_v54 = vadd.f32 %v1129_v31, %v1108_v32  ;;  %v950_v57 = vmul.f32 %v2849_v60, %v853_v22  ;;  %v1057_v29 = vmul.f32 %v2870_v13, %v852_v36 }
 0x15c   : > { %v929_v56 = vadd.f32 %v3836_v8, %v876_v38  ;;  %v1109_v6 = vadd.f32 %v1093_v37, %v1072_v9  ;;  %v1130_v48 = vmul.f32 %v3140_v44, %v3833_v61  ;;  %v1036_v1 = vadd.f32 %v3837_v3, %v999_v55  ;;  %v3840_v38 = vld [vmem:[#allocation25_spill] sm:$0xff] }
 0x15d   : > { %2313 = vmatprep.mubr.msk.f32.mxu1 %vm1220_vm4, %v3426_v34  ;;  %v1182_v17 = vadd.f32 %v1166_v51, %v1145_v54  ;;  %v1167_v58 = vmul.f32 %v3150_v45, %v3160_v14  ;;  %v1001_v40 = vadd.f32 %v985_v42, %v964_v10  ;;  %v1059_v60 = vmul.f32 %v2870_v13, %v853_v22 }
 0x15e   : > { %v966_v20 = vadd.f32 %v950_v57, %v929_v56  ;;  %v1146_v31 = vadd.f32 %v1130_v48, %v1109_v6  ;;  %v1073_v39 = vadd.f32 %v1057_v29, %v1036_v1  ;;  %v1094_v36 = vmul.f32 %v3125_v47, %v758_v0  ;;  %v1723_v56 = vld [vmem:[%s3753_s8 + $0x30] sm:$0xff] }
 0x15f   : > { %v3441_v62 = vadd.f32 %v3181_v12, %v1182_v17  ;;  %v1169_v41 = vmul.f32 %v3150_v45, %v3233_v11  ;;  %v1038_v27 = vadd.f32 %v3838_v2, %v1001_v40  ;;  %v1098_v14 = vmul.f32 %v3125_v47, %v3326_v26 }
 0x160   : > { %v1003_v51 = vadd.f32 %v3254_v24, %v966_v20  ;;  %v1183_v30 = vadd.f32 %v1167_v58, %v1146_v31  ;;  %v1110_v61 = vadd.f32 %v1094_v36, %v1073_v39  ;;  %v1131_v13 = vmul.f32 %v3140_v44, %v3069_v59 }
 0x161   : > { %v1150_v49 = vadd.f32 %v3316_v53, %v3340_v35  ;;  %2314 = vmatmul.mubr.msk.f32.gmra.mxu1 %vm1220_vm4, %v3441_v62  ;;  %v1185_v11 = vadd.f32 %v1169_v41, %v3266_v63  ;;  %v1075_v0 = vadd.f32 %v1059_v60, %v1038_v27  ;;  %v1168_v26 = vmul.f32 %v3150_v45, %v853_v22 }
 0x162   : > { %v1040_v25 = vadd.f32 %v3839_v18, %v1003_v51  ;;  %v3458_v24 = vadd.f32 %v3181_v12, %v1183_v30  ;;  %v1147_v47 = vadd.f32 %v1131_v13, %v1110_v61  ;;  %v1133_v59 = vmul.f32 %v3140_v44, %v3083_v19 }
 0x163   : > { %v1112_v10 = vadd.f32 %v3259_v43, %v1075_v0  ;;  %v1171_v53 = vmul.f32 %v3150_v45, %v3335_v15  ;;  %v855_v63 = vsel %vm795_vm2, %v824_v4, 0.0  ;;  %v1135_v32 = vmul.f32 %v3140_v44, %v3241_v21 }
 0x164   : > { %v1077_v35 = vadd.f32 %v3171_v23, %v1040_v25  ;;  %2316 = vmatprep.mubr.msk.f32.mxu1 %vm1220_vm4, %v3458_v24  ;;  %v1184_v22 = vadd.f32 %v1168_v26, %v1147_v47  ;;  %v1170_v19 = vmul.f32 %v3150_v45, %v3840_v38  ;;  %v3477_v43 = vadd.f32 %v3181_v12, %v1185_v11  ;;  %v1722_v38 = vld [vmem:[%s3753_s8 + $0x28] sm:$0xff] }
 0x165   : > { %v1149_v15 = vadd.f32 %v1133_v59, %v1112_v10  ;;  %v1187_v9 = vadd.f32 %v1171_v53, %v1150_v49  ;;  %v1172_v55 = vmul.f32 %v3150_v45, %v855_v63  ;;  %v1724_v45 = vld [vmem:[%s3753_s8 + $0x38] sm:$0xff] }
 0x166   : > { %v1114_v23 = vadd.f32 %v1098_v14, %v1077_v35  ;;  %v1207_v37 = vadd.f32 %v3181_v12, %v1184_v22  ;;  %2365 = vmatprep.subr.mxu1 %v1724_v45 }
 0x167   : > { %v1186_v42 = vadd.f32 %v1170_v19, %v1149_v15  ;;  %v3485_v44 = vadd.f32 %v3181_v12, %v1187_v9  ;;  %2366 = vmatpush3.msra.mxu1 %v1724_v45  ;;  %v1721_v19 = vld [vmem:[%s3753_s8 + $0x20] sm:$0xff]  ;;  %v1719_v15 = vld [vmem:[%s3753_s8 + $0x10] sm:$0xff]  ;;  %v1718_v9 = vld [vmem:[%s3753_s8 + $0x8] sm:$0xff] }
 0x168   : > { %v1151_v4 = vadd.f32 %v1135_v32, %v1114_v23  ;;  %2317 = vmatmul.mubr.msk.f32.gmra.mxu1 %vm1220_vm4, %v1207_v37  ;;  %2367 = vmatprep.subr.mxu1 %v1723_v56  ;;  %v1717_v23 = vld [vmem:[%s3753_s8] sm:$0xff] }
 0x169   : > { %2319 = vmatprep.mubr.msk.f32.mxu1 %vm1220_vm4, %v3477_v43  ;;  %v1209_v21 = vadd.f32 %v3181_v12, %v1186_v42  ;;  %2368 = vmatpush3.msra.mxu1 %v1723_v56  ;;  %v3618_v45 = vld [vmem:[%s3751_s6] ss:$0 sm:$0xff] }
 0x16a   : > { %v1188_v54 = vadd.f32 %v1172_v55, %v1151_v4  ;;  %2369 = vmatprep.subr.mxu1 %v1722_v38 }
 0x16b   : > { %2370 = vmatpush3.msra.mxu1 %v1722_v38 }
 0x16c   : > { %2320 = vmatmul.mubr.msk.f32.gmra.mxu1 %vm1220_vm4, %v1209_v21  ;;  %v3492_v8 = vadd.f32 %v3181_v12, %v1188_v54  ;;  %2371 = vmatprep.subr.mxu1 %v1721_v19 }
 0x16d   : > { %2322 = vmatprep.mubr.msk.f32.mxu1 %vm1220_vm4, %v3485_v44  ;;  %2372 = vmatpush3.msra.mxu1 %v1721_v19 }
 0x170   : > { %2323 = vmatmul.mubr.msk.f32.gmra.mxu1 %vm1220_vm4, %v3492_v8 }
 0x1f2   : > { %v2303_v57 = vpop.f32.mrf.mxu1 }
 0x1f3   : > { %v3503_v29 = vsub.f32 %v3217_v52, %v2303_v57 }
 0x1f4   : > { %v1335_v12 = vpop.f32.mrf.mxu1 }
 0x1f5   : > { %v3506_v6 = vsub.f32 %v3194_v28, %v1335_v12  ;;  %v1431_v3 = vmul.f32 %v3503_v29, %v3503_v29 }
 0x1f7   : > { %v1430_v48 = vmul.f32 %v3506_v6, %v3506_v6 }
 0x1f9   : > { %2341 = vmatprep.mubr.msk.f32.mxu0 %vm1220_vm4, %v1430_v48 }
 0x1fa   : > { %2342 = vmatmul.mubr.msk.f32.vlgmr.msra.gmra.mxu0 %vm1220_vm4, %v1431_v3 }
 0x203   : > { %v2306_v1 = vpop.f32.mrf.mxu1 }
 0x204   : > { %v3515_v17 = vsub.f32 %v3300_v5, %v2306_v1 }
 0x205   : > { %v1345_v52 = vpop.f32.mrf.mxu1 }
 0x206   : > { %v3518_v58 = vsub.f32 %v3251_v46, %v1345_v52  ;;  %v1433_v20 = vmul.f32 %v3515_v17, %v3515_v17 }
 0x208   : > { %v1432_v28 = vmul.f32 %v3518_v58, %v3518_v58 }
 0x20a   : > { %2344 = vmatprep.mubr.msk.f32.mxu0 %vm1220_vm4, %v1432_v28 }
 0x20b   : > { %2345 = vmatmul.mubr.msk.f32.gmra.mxu0 %vm1220_vm4, %v1433_v20 }
 0x210   : > { %v2309_v40 = vpop.f32.mrf.mxu1 }
 0x211   : > { %v3527_v31 = vsub.f32 %v3368_v7, %v2309_v40 }
 0x212   : > { %v1355_v5 = vpop.f32.mrf.mxu1 }
 0x213   : > { %v3530_v60 = vsub.f32 %v3311_v50, %v1355_v5  ;;  %v1435_v39 = vmul.f32 %v3527_v31, %v3527_v31 }
 0x215   : > { %v1434_v46 = vmul.f32 %v3530_v60, %v3530_v60 }
 0x217   : > { %2347 = vmatprep.mubr.msk.f32.mxu0 %vm1220_vm4, %v1434_v46 }
 0x218   : > { %v2312_v36 = vpop.f32.mrf.mxu1  ;;  %2348 = vmatmul.mubr.msk.f32.gmra.mxu0 %vm1220_vm4, %v1435_v39 }
 0x219   : > { %v3539_v41 = vsub.f32 %v3405_v33, %v2312_v36 }
 0x21a   : > { %v1365_v7 = vpop.f32.mrf.mxu1 }
 0x21b   : > { %v3542_v2 = vsub.f32 %v3390_v16, %v1365_v7  ;;  %v1437_v27 = vmul.f32 %v3539_v41, %v3539_v41 }
 0x21d   : > { %v1436_v50 = vmul.f32 %v3542_v2, %v3542_v2 }
 0x21f   : > { %2350 = vmatprep.mubr.msk.f32.mxu0 %vm1220_vm4, %v1436_v50 }
 0x220   : > { %2351 = vmatmul.mubr.msk.f32.gmra.mxu0 %vm1220_vm4, %v1437_v27 }
 0x221   : > { %v2315_v51 = vpop.f32.mrf.mxu1 }
 0x222   : > { %v3551_v14 = vsub.f32 %v3441_v62, %v2315_v51 }
 0x223   : > { %v1375_v33 = vpop.f32.mrf.mxu1 }
 0x224   : > { %v3554_v30 = vsub.f32 %v3426_v34, %v1375_v33  ;;  %v1439_v61 = vmul.f32 %v3551_v14, %v3551_v14 }
 0x226   : > { %v1438_v16 = vmul.f32 %v3554_v30, %v3554_v30 }
 0x228   : > { %v2318_v13 = vpop.f32.mrf.mxu1  ;;  %2353 = vmatprep.mubr.msk.f32.mxu0 %vm1220_vm4, %v1438_v16 }
 0x229   : > { %2354 = vmatmul.mubr.msk.f32.gmra.mxu0 %vm1220_vm4, %v1439_v61  ;;  %v3562_v49 = vsub.f32 %v1207_v37, %v2318_v13 }
 0x22a   : > { %v1385_v11 = vpop.f32.mrf.mxu1 }
 0x22b   : > { %v3565_v62 = vsub.f32 %v3458_v24, %v1385_v11  ;;  %v1441_v18 = vmul.f32 %v3562_v49, %v3562_v49 }
 0x22c   : > { %v2321_v0 = vpop.f32.mrf.mxu1 }
 0x22d   : > { %v1440_v34 = vmul.f32 %v3565_v62, %v3565_v62  ;;  %v3571_v25 = vsub.f32 %v1209_v21, %v2321_v0 }
 0x22e   : > { %v1395_v47 = vpop.f32.mrf.mxu1 }
 0x22f   : > { %v3574_v26 = vsub.f32 %v3477_v43, %v1395_v47  ;;  %2356 = vmatprep.mubr.msk.f32.mxu0 %vm1220_vm4, %v1440_v34  ;;  %v1443_v10 = vmul.f32 %v3571_v25, %v3571_v25  ;;  %v1720_v43 = vld [vmem:[%s3753_s8 + $0x18] sm:$0xff] }
 0x230   : > { %v2324_v59 = vpop.f32.mrf.mxu1  ;;  %2357 = vmatmul.mubr.msk.f32.gmra.mxu0 %vm1220_vm4, %v1441_v18  ;;  %2373 = vmatprep.subr.mxu1 %v1720_v43 }
 0x231   : > { %v1442_v24 = vmul.f32 %v3574_v26, %v3574_v26  ;;  %v3583_v53 = vsub.f32 %v3492_v8, %v2324_v59  ;;  %2374 = vmatpush3.msra.mxu1 %v1720_v43 }
 0x232   : > { %v1405_v35 = vpop.f32.mrf.mxu1  ;;  %2375 = vmatprep.subr.mxu1 %v1719_v15 }
 0x233   : > { %v3586_v63 = vsub.f32 %v3485_v44, %v1405_v35  ;;  %2359 = vmatprep.mubr.msk.f32.mxu0 %vm1220_vm4, %v1442_v24  ;;  %v1445_v22 = vmul.f32 %v3583_v53, %v3583_v53  ;;  %2376 = vmatpush3.msra.mxu1 %v1719_v15 }
 0x234   : > { %2360 = vmatmul.mubr.msk.f32.gmra.mxu0 %vm1220_vm4, %v1443_v10  ;;  %2377 = vmatprep.subr.mxu1 %v1718_v9 }
 0x235   : > { %v1444_v32 = vmul.f32 %v3586_v63, %v3586_v63  ;;  %2378 = vmatpush3.msra.mxu1 %v1718_v9 }
 0x236   : > { %2379 = vmatprep.subr.mxu1 %v1717_v23 }
 0x237   : > { %2362 = vmatprep.mubr.msk.f32.mxu0 %vm1220_vm4, %v1444_v32  ;;  %2380 = vmatpush3.msra.mxu1 %v1717_v23 }
 0x238   : > { %2363 = vmatmul.mubr.msk.f32.gmra.mxu0 %vm1220_vm4, %v1445_v22 }
 0x2ba   : > { %v2343_v37 = vpop.f32.mrf.mxu0 }
 0x2bb   : > { %v1566_v42 = vadd.f32 1e-05, %v2343_v37 }
 0x2bc   : > { %v1560_v4 = vpop.f32.mrf.mxu0 }
 0x2bd   : > { %2468 = vrsqrt.f32 %v1566_v42  ;;  %v1561_v55 = vadd.f32 1e-05, %v1560_v4 }
 0x2bf   : > { %2470 = vrsqrt.f32 %v1561_v55 }
 0x2ca   : > { %v2469_v21 = vpop.eup %2468 }
 0x2cb   : > { %v2346_v44 = vpop.f32.mrf.mxu0  ;;  %v1656_v8 = vmul.f32 %v2469_v21, %v3503_v29  ;;  %v3626_v29 = vld [vmem:[%s3752_s7] ss:$0 sm:$0xff] }
 0x2cc   : > { %v1576_v54 = vadd.f32 1e-05, %v2346_v44  ;;  %v2471_v57 = vpop.eup %2470 }
 0x2cd   : > { %v1570_v56 = vpop.f32.mrf.mxu0  ;;  %v1655_v48 = vmul.f32 %v2471_v57, %v3506_v6  ;;  %v1679_v3 = vmul.f32 %v3618_v45, %v1656_v8 }
 0x2ce   : > { %2472 = vrsqrt.f32 %v1576_v54  ;;  %v1571_v12 = vadd.f32 1e-05, %v1570_v56 }
 0x2cf   : > { %v1678_v1 = vmul.f32 %v3618_v45, %v1655_v48  ;;  %v1702_v28 = vadd.f32 %v3626_v29, %v1679_v3 }
 0x2d0   : > { %2474 = vrsqrt.f32 %v1571_v12 }
 0x2d1   : > { %v1701_v52 = vadd.f32 %v3626_v29, %v1678_v1 }
 0x2d3   : > { %2381 = vmatprep.mubr.msk.f32.mxu1 %vm1220_vm4, %v1701_v52 }
 0x2d4   : > { %2382 = vmatmul.mubr.msk.f32.vlgmr.msra.gmra.mxu1 %vm1220_vm4, %v1702_v28 }
 0x2d8   : > { %v2349_v20 = vpop.f32.mrf.mxu0 }
 0x2d9   : > { %v1586_v6 = vadd.f32 1e-05, %v2349_v20 }
 0x2da   : > { %v1580_v40 = vpop.f32.mrf.mxu0 }
 0x2db   : > { %2476 = vrsqrt.f32 %v1586_v6  ;;  %v1581_v5 = vadd.f32 1e-05, %v1580_v40  ;;  %v2473_v46 = vpop.eup %2472 }
 0x2dc   : > { %v1658_v39 = vmul.f32 %v2473_v46, %v3515_v17 }
 0x2dd   : > { %2478 = vrsqrt.f32 %v1581_v5  ;;  %v2475_v36 = vpop.eup %2474 }
 0x2de   : > { %v1657_v50 = vmul.f32 %v2475_v36, %v3518_v58  ;;  %v1681_v51 = vmul.f32 %v3618_v45, %v1658_v39 }
 0x2e0   : > { %v2352_v7 = vpop.f32.mrf.mxu0  ;;  %v1680_v16 = vmul.f32 %v3618_v45, %v1657_v50  ;;  %v1704_v11 = vadd.f32 %v3626_v29, %v1681_v51 }
 0x2e1   : > { %v1596_v27 = vadd.f32 1e-05, %v2352_v7 }
 0x2e2   : > { %v1590_v33 = vpop.f32.mrf.mxu0  ;;  %v1703_v13 = vadd.f32 %v3626_v29, %v1680_v16 }
 0x2e3   : > { %2480 = vrsqrt.f32 %v1596_v27  ;;  %v1591_v61 = vadd.f32 1e-05, %v1590_v33 }
 0x2e4   : > { %2384 = vmatprep.mubr.msk.f32.mxu1 %vm1220_vm4, %v1703_v13 }
 0x2e5   : > { %2482 = vrsqrt.f32 %v1591_v61  ;;  %2385 = vmatmul.mubr.msk.f32.gmra.mxu1 %vm1220_vm4, %v1704_v11 }
 0x2e8   : > { %v2477_v0 = vpop.eup %2476 }
 0x2e9   : > { %v2355_v17 = vpop.f32.mrf.mxu0  ;;  %v1660_v18 = vmul.f32 %v2477_v0, %v3527_v31 }
 0x2ea   : > { %v1606_v58 = vadd.f32 1e-05, %v2355_v17  ;;  %v2479_v47 = vpop.eup %2478 }
 0x2eb   : > { %v1600_v34 = vpop.f32.mrf.mxu0  ;;  %v1659_v24 = vmul.f32 %v2479_v47, %v3530_v60  ;;  %v1683_v10 = vmul.f32 %v3618_v45, %v1660_v18 }
 0x2ec   : > { %2484 = vrsqrt.f32 %v1606_v58  ;;  %v1601_v59 = vadd.f32 1e-05, %v1600_v34 }
 0x2ed   : > { %v1682_v35 = vmul.f32 %v3618_v45, %v1659_v24  ;;  %v1706_v15 = vadd.f32 %v3626_v29, %v1683_v10 }
 0x2ee   : > { %2486 = vrsqrt.f32 %v1601_v59 }
 0x2ef   : > { %v1705_v19 = vadd.f32 %v3626_v29, %v1682_v35 }
 0x2f0   : > { %v2358_v32 = vpop.f32.mrf.mxu0  ;;  %v2481_v22 = vpop.eup %2480 }
 0x2f1   : > { %v1616_v38 = vadd.f32 1e-05, %v2358_v32  ;;  %v1662_v31 = vmul.f32 %v2481_v22, %v3539_v41  ;;  %2387 = vmatprep.mubr.msk.f32.mxu1 %vm1220_vm4, %v1705_v19 }
 0x2f2   : > { %v1610_v43 = vpop.f32.mrf.mxu0  ;;  %v2483_v9 = vpop.eup %2482  ;;  %2388 = vmatmul.mubr.msk.f32.gmra.mxu1 %vm1220_vm4, %v1706_v15 }
 0x2f3   : > { %2488 = vrsqrt.f32 %v1616_v38  ;;  %v1611_v23 = vadd.f32 1e-05, %v1610_v43  ;;  %v1661_v37 = vmul.f32 %v2483_v9, %v3542_v2  ;;  %v1685_v4 = vmul.f32 %v3618_v45, %v1662_v31 }
 0x2f4   : > { %v2361_v60 = vpop.f32.mrf.mxu0 }
 0x2f5   : > { %2490 = vrsqrt.f32 %v1611_v23  ;;  %v1626_v42 = vadd.f32 1e-05, %v2361_v60  ;;  %v1684_v44 = vmul.f32 %v3618_v45, %v1661_v37  ;;  %v1708_v57 = vadd.f32 %v3626_v29, %v1685_v4 }
 0x2f6   : > { %v1620_v55 = vpop.f32.mrf.mxu0 }
 0x2f7   : > { %2492 = vrsqrt.f32 %v1626_v42  ;;  %v1621_v21 = vadd.f32 1e-05, %v1620_v55  ;;  %v1707_v54 = vadd.f32 %v3626_v29, %v1684_v44 }
 0x2f8   : > { %v2364_v41 = vpop.f32.mrf.mxu0 }
 0x2f9   : > { %v2485_v8 = vpop.eup %2484  ;;  %2494 = vrsqrt.f32 %v1621_v21  ;;  %v1636_v56 = vadd.f32 1e-05, %v2364_v41  ;;  %2390 = vmatprep.mubr.msk.f32.mxu1 %vm1220_vm4, %v1707_v54 }
 0x2fa   : > { %v1630_v12 = vpop.f32.mrf.mxu0  ;;  %v1664_v2 = vmul.f32 %v2485_v8, %v3551_v14  ;;  %2391 = vmatmul.mubr.msk.f32.gmra.mxu1 %vm1220_vm4, %v1708_v57 }
 0x2fb   : > { %v2487_v48 = vpop.eup %2486  ;;  %2496 = vrsqrt.f32 %v1636_v56  ;;  %v1631_v3 = vadd.f32 1e-05, %v1630_v12 }
 0x2fc   : > { %v1663_v1 = vmul.f32 %v2487_v48, %v3554_v30  ;;  %v1687_v52 = vmul.f32 %v3618_v45, %v1664_v2 }
 0x2fd   : > { %2498 = vrsqrt.f32 %v1631_v3 }
 0x2fe   : > { %v1686_v28 = vmul.f32 %v3618_v45, %v1663_v1  ;;  %v1710_v40 = vadd.f32 %v3626_v29, %v1687_v52 }
 0x300   : > { %v2489_v20 = vpop.eup %2488  ;;  %v1709_v6 = vadd.f32 %v3626_v29, %v1686_v28 }
 0x301   : > { %v1666_v5 = vmul.f32 %v2489_v20, %v3562_v49 }
 0x302   : > { %v2491_v14 = vpop.eup %2490  ;;  %2393 = vmatprep.mubr.msk.f32.mxu1 %vm1220_vm4, %v1709_v6 }
 0x303   : > { %2394 = vmatmul.mubr.msk.f32.gmra.mxu1 %vm1220_vm4, %v1710_v40  ;;  %v1665_v46 = vmul.f32 %v2491_v14, %v3565_v62  ;;  %v1689_v39 = vmul.f32 %v3618_v45, %v1666_v5 }
 0x304   : > { %v2493_v30 = vpop.eup %2492 }
 0x305   : > { %v1688_v36 = vmul.f32 %v3618_v45, %v1665_v46  ;;  %v1668_v7 = vmul.f32 %v2493_v30, %v3571_v25  ;;  %v1712_v33 = vadd.f32 %v3626_v29, %v1689_v39 }
 0x306   : > { %v2495_v50 = vpop.eup %2494 }
 0x307   : > { %v1711_v27 = vadd.f32 %v3626_v29, %v1688_v36  ;;  %v1667_v51 = vmul.f32 %v2495_v50, %v3574_v26  ;;  %v1691_v16 = vmul.f32 %v3618_v45, %v1668_v7 }
 0x308   : > { %v2497_v49 = vpop.eup %2496 }
 0x309   : > { %2396 = vmatprep.mubr.msk.f32.mxu1 %vm1220_vm4, %v1711_v27  ;;  %v1690_v62 = vmul.f32 %v3618_v45, %v1667_v51  ;;  %v1670_v61 = vmul.f32 %v2497_v49, %v3583_v53  ;;  %v1714_v11 = vadd.f32 %v3626_v29, %v1691_v16 }
 0x30a   : > { %v2499_v13 = vpop.eup %2498  ;;  %2397 = vmatmul.mubr.msk.f32.gmra.mxu1 %vm1220_vm4, %v1712_v33 }
 0x30b   : > { %v1713_v25 = vadd.f32 %v3626_v29, %v1690_v62  ;;  %v1669_v26 = vmul.f32 %v2499_v13, %v3586_v63  ;;  %v1693_v17 = vmul.f32 %v3618_v45, %v1670_v61  ;;  %v2139_v63 = vld [vmem:[%s3754_s9] ss:$0 sm:$0xff] }
 0x30d   : > { %2399 = vmatprep.mubr.msk.f32.mxu1 %vm1220_vm4, %v1713_v25  ;;  %v1692_v0 = vmul.f32 %v3618_v45, %v1669_v26  ;;  %v1716_v58 = vadd.f32 %v3626_v29, %v1693_v17 }
 0x30e   : > { %2400 = vmatmul.mubr.msk.f32.gmra.mxu1 %vm1220_vm4, %v1714_v11 }
 0x30f   : > { %v1715_v53 = vadd.f32 %v3626_v29, %v1692_v0 }
 0x311   : > { %2402 = vmatprep.mubr.msk.f32.mxu1 %vm1220_vm4, %v1715_v53 }
 0x312   : > { %2403 = vmatmul.mubr.msk.f32.gmra.mxu1 %vm1220_vm4, %v1716_v58 }
 0x394   : > { %v2383_v45 = vpop.f32.mrf.mxu1 }
 0x395   : > { %v1852_v29 = vadd.f32 %v2383_v45, %v2139_v63 }
 0x396   : > { %v1846_v34 = vpop.f32.mrf.mxu1 }
 0x397   : > { %1927 = vst.msk [vmem:[%s3696_s21 + $0x8] sm:$0xff] %vm1925_vm5, %v1852_v29  ;;  %v1847_v18 = vadd.f32 %v2139_v63, %v1846_v34 }
 0x399   : > { %1926 = vst.msk [vmem:[%s3696_s21] sm:$0xff] %vm1925_vm5, %v1847_v18 }
 0x3a5   : > { %v2386_v47 = vpop.f32.mrf.mxu1 }
 0x3a6   : > { %v1862_v59 = vadd.f32 %v2386_v47, %v2139_v63 }
 0x3a7   : > { %v1856_v24 = vpop.f32.mrf.mxu1 }
 0x3a8   : > { %1929 = vst.msk [vmem:[%s3696_s21 + $0x18] sm:$0xff] %vm1925_vm5, %v1862_v59  ;;  %v1857_v10 = vadd.f32 %v2139_v63, %v1856_v24 }
 0x3aa   : > { %1928 = vst.msk [vmem:[%s3696_s21 + $0x10] sm:$0xff] %vm1925_vm5, %v1857_v10 }
 0x3b2   : > { %v2389_v35 = vpop.f32.mrf.mxu1 }
 0x3b3   : > { %v1872_v32 = vadd.f32 %v2389_v35, %v2139_v63 }
 0x3b4   : > { %v1866_v22 = vpop.f32.mrf.mxu1 }
 0x3b5   : > { %1931 = vst.msk [vmem:[%s3696_s21 + $0x28] sm:$0xff] %vm1925_vm5, %v1872_v32  ;;  %v1867_v38 = vadd.f32 %v2139_v63, %v1866_v22 }
 0x3b7   : > { %1930 = vst.msk [vmem:[%s3696_s21 + $0x20] sm:$0xff] %vm1925_vm5, %v1867_v38 }
 0x3ba   : > { %v2392_v19 = vpop.f32.mrf.mxu1 }
 0x3bb   : > { %v1882_v43 = vadd.f32 %v2392_v19, %v2139_v63 }
 0x3bc   : > { %v1876_v15 = vpop.f32.mrf.mxu1 }
 0x3bd   : > { %1933 = vst.msk [vmem:[%s3696_s21 + $0x38] sm:$0xff] %vm1925_vm5, %v1882_v43  ;;  %v1877_v31 = vadd.f32 %v2139_v63, %v1876_v15 }
 0x3bf   : > { %1932 = vst.msk [vmem:[%s3696_s21 + $0x30] sm:$0xff] %vm1925_vm5, %v1877_v31 }
 0x3c3   : > { %v2395_v9 = vpop.f32.mrf.mxu1 }
 0x3c4   : > { %v1892_v23 = vadd.f32 %v2395_v9, %v2139_v63 }
 0x3c5   : > { %v1886_v60 = vpop.f32.mrf.mxu1 }
 0x3c6   : > { %1935 = vst.msk [vmem:[%s3696_s21 + $0x48] sm:$0xff] %vm1925_vm5, %v1892_v23  ;;  %v1887_v37 = vadd.f32 %v2139_v63, %v1886_v60 }
 0x3c8   : > { %1934 = vst.msk [vmem:[%s3696_s21 + $0x40] sm:$0xff] %vm1925_vm5, %v1887_v37 }
 0x3ca   : > { %v2398_v42 = vpop.f32.mrf.mxu1 }
 0x3cb   : > { %v1902_v4 = vadd.f32 %v2398_v42, %v2139_v63 }
 0x3cc   : > { %v1896_v55 = vpop.f32.mrf.mxu1 }
 0x3cd   : > { %1937 = vst.msk [vmem:[%s3696_s21 + $0x58] sm:$0xff] %vm1925_vm5, %v1902_v4  ;;  %v1897_v44 = vadd.f32 %v2139_v63, %v1896_v55 }
 0x3ce   : > { %v2401_v21 = vpop.f32.mrf.mxu1 }
 0x3cf   : > { %1936 = vst.msk [vmem:[%s3696_s21 + $0x50] sm:$0xff] %vm1925_vm5, %v1897_v44  ;;  %v1912_v41 = vadd.f32 %v2401_v21, %v2139_v63 }
 0x3d0   : > { %v1906_v54 = vpop.f32.mrf.mxu1 }
 0x3d1   : > { %1939 = vst.msk [vmem:[%s3696_s21 + $0x68] sm:$0xff] %vm1925_vm5, %v1912_v41  ;;  %v1907_v8 = vadd.f32 %v2139_v63, %v1906_v54 }
 0x3d2   : > { %v2404_v56 = vpop.f32.mrf.mxu1 }
 0x3d3   : > { %1938 = vst.msk [vmem:[%s3696_s21 + $0x60] sm:$0xff] %vm1925_vm5, %v1907_v8  ;;  %v1922_v57 = vadd.f32 %v2404_v56, %v2139_v63 }
 0x3d4   : > { %v1916_v12 = vpop.f32.mrf.mxu1 }
 0x3d5   : > { %1941 = vst.msk [vmem:[%s3696_s21 + $0x78] sm:$0xff] %vm1925_vm5, %v1922_v57  ;;  %v1917_v2 = vadd.f32 %v2139_v63, %v1916_v12 }
 0x3d7   : > { %1940 = vst.msk [vmem:[%s3696_s21 + $0x70] sm:$0xff] %vm1925_vm5, %v1917_v2 }
 0x3d8 PF: > { %s22_s17 = sadd.s32 1, %s2598_s17   ;;  %s3841_s13 = smov %s2590_s15 }
 0x3d9   : > { %p19_p1 = scmp.ge.s32.totalorder %s22_s17, 6   ;;  %s3842_s14 = smov %s2594_s16 }
 0x3da   : > { %s3843_s15 = smov %s3846_s19  ;;  %s3844_s16 = smov %s3850_s20 }
 0x3db   :  { %21 = sbr.rel (!%p19_p1) target bundleno = 4 (0x4), region = 102 }
 0x3e0   :  { %1972 = vsyncpa [#allocation3], 1 }
 0x3e1   :  { %1974 = vsyncpa [#allocation3 + $0x1], 1 }
 0x3e2   :  { %1975 = vsyncpa [#allocation5], 1 }

</bundles_post_ra>
